<compile_context>
chip_gen: v7x
topology: tpu7x:2x2x1
jax: 0.10.0
libtpu: 0.0.40
codegen_flags: <defaults>
</compile_context>

<pallas_src>
import functools

import jax
import jax.numpy as jnp
from jax.experimental import pallas as pl
from jax.experimental.pallas import tpu as pltpu


# ----------------------------- fused Pallas kernel -----------------------------

def _fcmsgnn_kernel(x_ref, slab_ref, out_ref, *, off, bs, num_nodes, time_len,
                    c1, c2, hidden, decay):
    """Whole FCMSGNN forward on one TensorCore; all params come from one lane-dense slab."""
    f32 = jnp.float32
    bp = bs * num_nodes          # rows after the A_input reshape (graph nodes across the batch)
    l1 = time_len                # conv1 length
    l2 = l1 // 2                 # after pool1
    l3 = l2 // 2                 # after pool2 (== conv_out)
    two_h = 2 * hidden

    def band(name):              # load one packed parameter (static slab slice)
        r0, nr, nc = off[name]
        return slab_ref[r0:r0 + nr, 0:nc]

    def band_part(name, r_lo, r_hi, c_lo, c_hi):
        r0 = off[name][0]
        return slab_ref[r0 + r_lo:r0 + r_hi, c_lo:c_hi]

    # ---- conv1 (k=3, pad=1, in_ch=1) + ReLU + maxpool1 ---------------------------------------
    # Time is handled as static lane slices of the (bp, l1) input: three VPU broadcast-FMAs per
    # step.  No im2col patches, no select/shift matrices, no boundary masks.
    x = x_ref[...]                                           # (bp, l1)
    w1 = band("conv1")                                       # (4, c1): 3 taps + bias
    zc = jnp.zeros((bp, 1), f32)
    cols = [x[:, t:t + 1] for t in range(l1)]
    cols_l = [zc] + cols[:l1 - 1]                            # x[t-1] (zero padded)
    cols_r = cols[1:] + [zc]                                 # x[t+1] (zero padded)
    y1 = [jnp.maximum(a * w1[0:1, :] + b * w1[1:2, :] + c * w1[2:3, :] + w1[3:4, :], 0.0)
          for a, b, c in zip(cols_l, cols, cols_r)]          # l1 x (bp, c1)
    x2 = [jnp.maximum(y1[2 * u], y1[2 * u + 1]) for u in range(l2)]   # maxpool1 -> l2 x (bp, c1)

    # ---- conv2 (k=3, pad=1, c1 -> c2) + ReLU + maxpool2 --------------------------------------
    # Batched over the pooled time axis (u-major rows) so it is exactly 3 channel matmuls.
    zp = jnp.zeros((bp, c1), f32)
    cur = jnp.concatenate(x2, axis=0)                        # (l2*bp, c1), rows = (u, sample)
    prv = jnp.concatenate([zp] + x2[:l2 - 1], axis=0)        # x2[u-1] (zero padded)
    nxt = jnp.concatenate(x2[1:] + [zp], axis=0)             # x2[u+1] (zero padded)
    w2 = band("conv2")                                       # (3*c1 + 1, c2): 3 tap blocks + bias
    y2 = (jnp.dot(prv, w2[0:c1, :], preferred_element_type=f32)
          + jnp.dot(cur, w2[c1:2 * c1, :], preferred_element_type=f32)
          + jnp.dot(nxt, w2[2 * c1:3 * c1, :], preferred_element_type=f32)
          + w2[3 * c1:3 * c1 + 1, :])
    y2 = jnp.maximum(y2, 0.0)                                # (l2*bp, c2)
    x3 = [jnp.maximum(y2[(2 * v) * bp:(2 * v + 1) * bp, :],
                      y2[(2 * v + 1) * bp:(2 * v + 2) * bp, :])
          for v in range(l3)]                                # maxpool2 -> l3 x (bp, c2)

    # ---- nonlin_map2 (Linear + folded BatchNorm) + positional encoding ------------------------
    # BN eval-scale and the PE are pre-folded into wmap2 / the (bp, 2h) "pe_b" band (wrapper).
    h = band("pe_b")                                         # (bp, 2h)
    for v in range(l3):
        h = h + jnp.dot(x3[v], band_part("wmap2", v * c2, (v + 1) * c2, 0, two_h),
                        preferred_element_type=f32)

    # ---- MPNN1 + MPNN2 with ONE shared adjacency: softmax(relu(h hᵀ)·decay), block-diag -------
    scores = jax.lax.dot_general(h, h, (((1,), (1,)), ((), ())),
                                 preferred_element_type=f32)          # (bp, bp), no h.T copy
    scores = jnp.maximum(scores, 0.0) * decay
    ri = jax.lax.broadcasted_iota(jnp.int32, (bp, bp), 0)
    ci = jax.lax.broadcasted_iota(jnp.int32, (bp, bp), 1)
    if num_nodes & (num_nodes - 1) == 0:                     # arithmetic block-diagonal mask
        blk = ~(num_nodes - 1)
        same = (ri & blk) == (ci & blk)
    else:                                                    # generic fallback (tiny bs)
        same = None
        for b in range(bs):
            lo, hi = b * num_nodes, (b + 1) * num_nodes
            m = (ri >= lo) & (ri < hi) & (ci >= lo) & (ci < hi)
            same = m if same is None else (same | m)
    scores = jnp.where(same, scores, -1e30)
    mx = jnp.max(scores, axis=-1, keepdims=True)
    p = jnp.exp(scores - mx)
    attn = p / jnp.sum(p, axis=-1, keepdims=True)            # exact softmax denominator
    msg = jnp.dot(attn, h, preferred_element_type=f32)       # (bp, 2h)
    hid = jnp.maximum(jnp.dot(msg, band("wmpnn"), preferred_element_type=f32)
                      + band("bmpnn"), 0.0)                  # (bp, 2h) = [MPNN1 | MPNN2]

    # ---- FC head: (window, node, hidden) flatten/concat folded into node-blocked fc1 weights --
    f1 = band("fc1b")                                        # (1, 2h), broadcasts over batch
    for n in range(num_nodes):
        hn = jnp.concatenate(
            [hid[b * num_nodes + n:b * num_nodes + n + 1, :] for b in range(bs)], axis=0)
        f1 = f1 + jnp.dot(hn, band_part("fc1w", 0, two_h, n * two_h, (n + 1) * two_h),
                          preferred_element_type=f32)
    f1 = jnp.maximum(f1, 0.0)
    f2 = jnp.maximum(jnp.dot(f1, band("fc2w"), preferred_element_type=f32) + band("fc2b"), 0.0)
    f3 = jnp.maximum(jnp.dot(f2, band("fc3w"), preferred_element_type=f32) + band("fc3b"), 0.0)
    out = jnp.dot(f3, band("fc4w"), preferred_element_type=f32) + band("fc4b")   # (bs, 128)
    out_ref[...] = out.astype(out_ref.dtype)


# ----------------------------- trace-time parameter prep -----------------------------

def sinusoidal_pe(length, d_model):
    pos = jnp.arange(length, dtype=jnp.float32)[:, None]
    div = jnp.exp(jnp.arange(0, d_model, 2, dtype=jnp.float32) * (-jnp.log(10000.0) / d_model))
    pe = jnp.zeros((length, d_model), jnp.float32)
    pe = pe.at[:, 0::2].set(jnp.sin(pos * div))
    pe = pe.at[:, 1::2].set(jnp.cos(pos * div))
    return pe


def _pack_slab(entries, width=128):
    """Pack small 2-D f32 params into one lane-dense (R, width) slab (single DMA).

    Returns (slab, offsets) with offsets[name] = (row_start, rows, cols); each entry's row band
    is 8-row aligned so in-kernel static slices stay tile friendly.
    """
    pieces, off, r = [], {}, 0
    for name, arr in entries:
        arr = jnp.asarray(arr, jnp.float32)
        nr, nc = arr.shape
        assert nc <= width, (name, arr.shape)
        off[name] = (r, nr, nc)
        pad_r = (-nr) % 8
        pieces.append(jnp.pad(arr, ((0, pad_r), (0, width - nc))))
        r += nr + pad_r
    return jnp.concatenate(pieces, axis=0), off


CFG = dict(
    bs=2,
    dimension=16,          # time length per sample (x_enc dim 1)
    num_nodes=4,
    conv_kernel=3,
    lstmhidden_dim=8,
    lstmout_dim=8,
    conv_out=4,            # 16 -> pool2 -> 8 -> pool2 -> 4
    hidden_dim=16,         # 2*hidden_dim = 32
    num_windows=2,         # MPNN1 + MPNN2 each contribute one window of (num_nodes, hidden)
    n_class=3,
    decay=0.7,
)


def init_params(key, cfg):
    ks = jax.random.split(key, 12)
    w = lambda k, shape, s=0.1: jax.random.normal(k, shape, jnp.float32) * s
    h = cfg["hidden_dim"]
    p = {}
    p["conv1_w"] = w(ks[0], (cfg["conv_kernel"], 1, cfg["lstmhidden_dim"]))
    p["conv1_b"] = jnp.zeros((cfg["lstmhidden_dim"],), jnp.float32)
    p["conv2_w"] = w(ks[1], (cfg["conv_kernel"], cfg["lstmhidden_dim"], cfg["lstmout_dim"]))
    p["conv2_b"] = jnp.zeros((cfg["lstmout_dim"],), jnp.float32)
    p["map2_w"] = w(ks[2], (cfg["lstmout_dim"] * cfg["conv_out"], 2 * h))
    p["map2_b"] = jnp.zeros((2 * h,), jnp.float32)
    p["mpnn1_w"] = w(ks[3], (2 * h, h)); p["mpnn1_b"] = jnp.zeros((h,), jnp.float32)
    p["mpnn2_w"] = w(ks[4], (2 * h, h)); p["mpnn2_b"] = jnp.zeros((h,), jnp.float32)
    fin = h * cfg["num_windows"] * cfg["num_nodes"]
    p["fc1_w"] = w(ks[5], (fin, 2 * h));   p["fc1_b"] = jnp.zeros((2 * h,), jnp.float32)
    p["fc2_w"] = w(ks[6], (2 * h, 2 * h)); p["fc2_b"] = jnp.zeros((2 * h,), jnp.float32)
    p["fc3_w"] = w(ks[7], (2 * h, h));     p["fc3_b"] = jnp.zeros((h,), jnp.float32)
    p["fc4_w"] = w(ks[8], (h, cfg["n_class"])); p["fc4_b"] = jnp.zeros((cfg["n_class"],), jnp.float32)
    return p


def model_forward(params, cfg, x_enc, x_mark_enc=None, x_dec=None, x_mark_dec=None, mask=None):
    bs, dimension, num_nodes = x_enc.shape
    f32 = jnp.float32
    k = cfg["conv_kernel"]
    c1 = cfg["lstmhidden_dim"]
    c2 = cfg["lstmout_dim"]
    h_dim = cfg["hidden_dim"]
    two_h = 2 * h_dim
    n_class = cfg["n_class"]
    out_lanes = 128                       # lane-dense kernel output; sliced back to n_class below

    l1 = dimension
    l2 = l1 // 2
    l3 = l2 // 2
    bp = bs * num_nodes

    assert k == 3                                    # in-kernel 3-tap formulation
    assert l1 % 4 == 0 and l1 >= 4                   # two /2 max-pools
    assert cfg["conv_out"] == l3
    assert two_h <= 128 and num_nodes * two_h <= 128 and n_class <= out_lanes

    # A_input = reshape(x_enc, [bs*num_nodes, dimension, 1]) (raw row-major reshape, as in torch).
    # The kernel consumes this lane-dense (bp, l1) block directly and builds the conv taps itself.
    x2d = x_enc.reshape(bp, l1).astype(f32)

    # --- pack every parameter into one lane-dense (R, 128) slab --------------------------------
    w1 = params["conv1_w"].reshape(k, c1).astype(f32)
    b1 = params["conv1_b"].reshape(1, c1).astype(f32)
    w2 = params["conv2_w"].reshape(k * c1, c2).astype(f32)
    b2 = params["conv2_b"].reshape(1, c2).astype(f32)

    # BatchNorm1d (eval mode, default running stats mean=0/var=1) folded into the map2 linear;
    # the map2 bias and the sinusoidal positional encoding are pre-combined into one (bp, 2h) band.
    bn_scale = 1.0 / jnp.sqrt(1.0 + 1e-5)
    wmap2 = (params["map2_w"] * bn_scale).astype(f32)
    pe_b = ((params["map2_b"] * bn_scale).reshape(1, two_h)
            + jnp.tile(sinusoidal_pe(num_nodes, two_h), (bs, 1))).astype(f32)

    # Both MPNN blocks share input + adjacency -> concatenate their graph-conv weights.
    wmpnn = jnp.concatenate([params["mpnn1_w"], params["mpnn2_w"]], axis=1).astype(f32)
    bmpnn = jnp.concatenate([params["mpnn1_b"], params["mpnn2_b"]],
                            axis=0).reshape(1, two_h).astype(f32)

    # Fold the (window, node, hidden) flatten/concat into per-node fc1 blocks, side by side in lanes.
    fc1_w = params["fc1_w"].astype(f32)
    node_blocks = []
    for n in range(num_nodes):
        top = fc1_w[n * h_dim:(n + 1) * h_dim, :]                                          # MPNN1
        bot = fc1_w[num_nodes * h_dim + n * h_dim:num_nodes * h_dim + (n + 1) * h_dim, :]  # MPNN2
        node_blocks.append(jnp.concatenate([top, bot], axis=0))
    fc1w_wide = jnp.concatenate(node_blocks, axis=1)                  # (2h, num_nodes*2h)

    slab, off = _pack_slab([
        ("conv1", jnp.concatenate([w1, b1], axis=0)),                 # (4, c1)
        ("conv2", jnp.concatenate([w2, b2], axis=0)),                 # (3*c1+1, c2)
        ("pe_b", pe_b),                                               # (bp, 2h)
        ("wmap2", wmap2),                                             # (l3*c2, 2h)
        ("wmpnn", wmpnn),                                             # (2h, 2h)
        ("bmpnn", bmpnn),                                             # (1, 2h)
        ("fc1w", fc1w_wide),                                          # (2h, num_nodes*2h)
        ("fc1b", params["fc1_b"].reshape(1, two_h).astype(f32)),
        ("fc2w", params["fc2_w"].astype(f32)),
        ("fc2b", params["fc2_b"].reshape(1, two_h).astype(f32)),
        ("fc3w", params["fc3_w"].astype(f32)),
        ("fc3b", params["fc3_b"].reshape(1, h_dim).astype(f32)),
        ("fc4w", jnp.pad(params["fc4_w"].astype(f32), ((0, 0), (0, out_lanes - n_class)))),
        ("fc4b", jnp.pad(params["fc4_b"].astype(f32),
                         (0, out_lanes - n_class)).reshape(1, out_lanes)),
    ])

    kernel = functools.partial(
        _fcmsgnn_kernel, off=off, bs=bs, num_nodes=num_nodes, time_len=l1,
        c1=c1, c2=c2, hidden=h_dim, decay=float(cfg["decay"]))

    out = pl.pallas_call(
        kernel,
        out_shape=jax.ShapeDtypeStruct((bs, out_lanes), f32),
        grid=(1,),                                   # single fused step; bs=2 too small to shard
        in_specs=[pl.BlockSpec(x2d.shape, lambda i: (0, 0)),
                  pl.BlockSpec(slab.shape, lambda i: (0, 0))],
        out_specs=pl.BlockSpec((bs, out_lanes), lambda i: (0, 0)),
        compiler_params=pltpu.CompilerParams(
            dimension_semantics=("arbitrary",),      # keep on one TensorCore (v7x-safe)
            vmem_limit_bytes=16 * 1024 * 1024,       # live data << 1 MiB; modest limit is plenty
        ),
    )(x2d, slab)
    return out[:, :n_class]


if __name__ == "__main__":
    key = jax.random.PRNGKey(0)
    k_param, k_x = jax.random.split(key)
    params = init_params(k_param, CFG)

    bs, dim, nn_ = CFG["bs"], CFG["dimension"], CFG["num_nodes"]
    x_enc = jax.random.normal(k_x, (bs, dim, nn_), jnp.float32)

    forward = jax.jit(lambda p, x: model_forward(p, CFG, x))
    out = jax.block_until_ready(forward(params, x_enc))
    assert out.shape == (bs, CFG["n_class"])
    assert bool(jnp.all(jnp.isfinite(out)))
    print("KERNEL_OK")
</pallas_src>

<mosaic_0001>
module attributes {stable_mosaic.version = 11 : i64} {
  func.func @_fcmsgnn_kernel(%arg0: i32, %arg1: memref<8x16xf32, #tpu.memory_space<vmem>>, %arg2: memref<264x128xf32, #tpu.memory_space<vmem>>, %arg3: memref<2x128xf32, #tpu.memory_space<vmem>>) attributes {dimension_semantics = [#tpu.dimension_semantics<arbitrary>], iteration_bounds = array<i64: 1>, scalar_prefetch = 0 : i64, scratch_operands = 0 : i64, tpu.core_type = #tpu.core_type<tc>, window_params = [{pipeline_mode = #tpu.pipeline_mode<synchronous>, transform_indices = @transform_0, window_bounds = array<i64: 8, 16>}, {pipeline_mode = #tpu.pipeline_mode<synchronous>, transform_indices = @transform_1, window_bounds = array<i64: 264, 128>}, {pipeline_mode = #tpu.pipeline_mode<synchronous>, transform_indices = @transform_2, window_bounds = array<i64: 2, 128>}]} {
    %c0 = arith.constant 0 : index
    %c0_0 = arith.constant 0 : index
    %0 = vector.load %arg1[%c0, %c0_0] : memref<8x16xf32, #tpu.memory_space<vmem>>, vector<8x16xf32>
    %c0_1 = arith.constant 0 : index
    %c0_2 = arith.constant 0 : index
    %1 = vector.load %arg2[%c0_1, %c0_2] : memref<264x128xf32, #tpu.memory_space<vmem>>, vector<4x8xf32>
    %cst = arith.constant 0.000000e+00 : f32
    %2 = vector.broadcast %cst : f32 to vector<8x1xf32>
    %3 = vector.extract_strided_slice %0 {offsets = [0, 0], sizes = [8, 1], strides = [1, 1]} : vector<8x16xf32> to vector<8x1xf32>
    %4 = vector.extract_strided_slice %0 {offsets = [0, 1], sizes = [8, 1], strides = [1, 1]} : vector<8x16xf32> to vector<8x1xf32>
    %5 = vector.extract_strided_slice %0 {offsets = [0, 2], sizes = [8, 1], strides = [1, 1]} : vector<8x16xf32> to vector<8x1xf32>
    %6 = vector.extract_strided_slice %0 {offsets = [0, 3], sizes = [8, 1], strides = [1, 1]} : vector<8x16xf32> to vector<8x1xf32>
    %7 = vector.extract_strided_slice %0 {offsets = [0, 4], sizes = [8, 1], strides = [1, 1]} : vector<8x16xf32> to vector<8x1xf32>
    %8 = vector.extract_strided_slice %0 {offsets = [0, 5], sizes = [8, 1], strides = [1, 1]} : vector<8x16xf32> to vector<8x1xf32>
    %9 = vector.extract_strided_slice %0 {offsets = [0, 6], sizes = [8, 1], strides = [1, 1]} : vector<8x16xf32> to vector<8x1xf32>
    %10 = vector.extract_strided_slice %0 {offsets = [0, 7], sizes = [8, 1], strides = [1, 1]} : vector<8x16xf32> to vector<8x1xf32>
    %11 = vector.extract_strided_slice %0 {offsets = [0, 8], sizes = [8, 1], strides = [1, 1]} : vector<8x16xf32> to vector<8x1xf32>
    %12 = vector.extract_strided_slice %0 {offsets = [0, 9], sizes = [8, 1], strides = [1, 1]} : vector<8x16xf32> to vector<8x1xf32>
    %13 = vector.extract_strided_slice %0 {offsets = [0, 10], sizes = [8, 1], strides = [1, 1]} : vector<8x16xf32> to vector<8x1xf32>
    %14 = vector.extract_strided_slice %0 {offsets = [0, 11], sizes = [8, 1], strides = [1, 1]} : vector<8x16xf32> to vector<8x1xf32>
    %15 = vector.extract_strided_slice %0 {offsets = [0, 12], sizes = [8, 1], strides = [1, 1]} : vector<8x16xf32> to vector<8x1xf32>
    %16 = vector.extract_strided_slice %0 {offsets = [0, 13], sizes = [8, 1], strides = [1, 1]} : vector<8x16xf32> to vector<8x1xf32>
    %17 = vector.extract_strided_slice %0 {offsets = [0, 14], sizes = [8, 1], strides = [1, 1]} : vector<8x16xf32> to vector<8x1xf32>
    %18 = vector.extract_strided_slice %0 {offsets = [0, 15], sizes = [8, 1], strides = [1, 1]} : vector<8x16xf32> to vector<8x1xf32>
    %19 = vector.extract_strided_slice %1 {offsets = [0, 0], sizes = [1, 8], strides = [1, 1]} : vector<4x8xf32> to vector<1x8xf32>
    %20 = vector.broadcast %2 : vector<8x1xf32> to vector<8x8xf32>
    %21 = vector.broadcast %19 : vector<1x8xf32> to vector<8x8xf32>
    %22 = arith.mulf %20, %21 : vector<8x8xf32>
    %23 = vector.extract_strided_slice %1 {offsets = [1, 0], sizes = [1, 8], strides = [1, 1]} : vector<4x8xf32> to vector<1x8xf32>
    %24 = vector.broadcast %3 : vector<8x1xf32> to vector<8x8xf32>
    %25 = vector.broadcast %23 : vector<1x8xf32> to vector<8x8xf32>
    %26 = arith.mulf %24, %25 : vector<8x8xf32>
    %27 = arith.addf %22, %26 : vector<8x8xf32>
    %28 = vector.extract_strided_slice %1 {offsets = [2, 0], sizes = [1, 8], strides = [1, 1]} : vector<4x8xf32> to vector<1x8xf32>
    %29 = vector.broadcast %4 : vector<8x1xf32> to vector<8x8xf32>
    %30 = vector.broadcast %28 : vector<1x8xf32> to vector<8x8xf32>
    %31 = arith.mulf %29, %30 : vector<8x8xf32>
    %32 = arith.addf %27, %31 : vector<8x8xf32>
    %33 = vector.extract_strided_slice %1 {offsets = [3, 0], sizes = [1, 8], strides = [1, 1]} : vector<4x8xf32> to vector<1x8xf32>
    %34 = vector.broadcast %33 : vector<1x8xf32> to vector<8x8xf32>
    %35 = arith.addf %32, %34 : vector<8x8xf32>
    %cst_3 = arith.constant 0.000000e+00 : f32
    %36 = vector.broadcast %cst_3 : f32 to vector<8x8xf32>
    %37 = arith.maximumf %35, %36 : vector<8x8xf32>
    %38 = vector.extract_strided_slice %1 {offsets = [0, 0], sizes = [1, 8], strides = [1, 1]} : vector<4x8xf32> to vector<1x8xf32>
    %39 = vector.broadcast %3 : vector<8x1xf32> to vector<8x8xf32>
    %40 = vector.broadcast %38 : vector<1x8xf32> to vector<8x8xf32>
    %41 = arith.mulf %39, %40 : vector<8x8xf32>
    %42 = vector.extract_strided_slice %1 {offsets = [1, 0], sizes = [1, 8], strides = [1, 1]} : vector<4x8xf32> to vector<1x8xf32>
    %43 = vector.broadcast %4 : vector<8x1xf32> to vector<8x8xf32>
    %44 = vector.broadcast %42 : vector<1x8xf32> to vector<8x8xf32>
    %45 = arith.mulf %43, %44 : vector<8x8xf32>
    %46 = arith.addf %41, %45 : vector<8x8xf32>
    %47 = vector.extract_strided_slice %1 {offsets = [2, 0], sizes = [1, 8], strides = [1, 1]} : vector<4x8xf32> to vector<1x8xf32>
    %48 = vector.broadcast %5 : vector<8x1xf32> to vector<8x8xf32>
    %49 = vector.broadcast %47 : vector<1x8xf32> to vector<8x8xf32>
    %50 = arith.mulf %48, %49 : vector<8x8xf32>
    %51 = arith.addf %46, %50 : vector<8x8xf32>
    %52 = vector.extract_strided_slice %1 {offsets = [3, 0], sizes = [1, 8], strides = [1, 1]} : vector<4x8xf32> to vector<1x8xf32>
    %53 = vector.broadcast %52 : vector<1x8xf32> to vector<8x8xf32>
    %54 = arith.addf %51, %53 : vector<8x8xf32>
    %cst_4 = arith.constant 0.000000e+00 : f32
    %55 = vector.broadcast %cst_4 : f32 to vector<8x8xf32>
    %56 = arith.maximumf %54, %55 : vector<8x8xf32>
    %57 = vector.extract_strided_slice %1 {offsets = [0, 0], sizes = [1, 8], strides = [1, 1]} : vector<4x8xf32> to vector<1x8xf32>
    %58 = vector.broadcast %4 : vector<8x1xf32> to vector<8x8xf32>
    %59 = vector.broadcast %57 : vector<1x8xf32> to vector<8x8xf32>
    %60 = arith.mulf %58, %59 : vector<8x8xf32>
    %61 = vector.extract_strided_slice %1 {offsets = [1, 0], sizes = [1, 8], strides = [1, 1]} : vector<4x8xf32> to vector<1x8xf32>
    %62 = vector.broadcast %5 : vector<8x1xf32> to vector<8x8xf32>
    %63 = vector.broadcast %61 : vector<1x8xf32> to vector<8x8xf32>
    %64 = arith.mulf %62, %63 : vector<8x8xf32>
    %65 = arith.addf %60, %64 : vector<8x8xf32>
    %66 = vector.extract_strided_slice %1 {offsets = [2, 0], sizes = [1, 8], strides = [1, 1]} : vector<4x8xf32> to vector<1x8xf32>
    %67 = vector.broadcast %6 : vector<8x1xf32> to vector<8x8xf32>
    %68 = vector.broadcast %66 : vector<1x8xf32> to vector<8x8xf32>
    %69 = arith.mulf %67, %68 : vector<8x8xf32>
    %70 = arith.addf %65, %69 : vector<8x8xf32>
    %71 = vector.extract_strided_slice %1 {offsets = [3, 0], sizes = [1, 8], strides = [1, 1]} : vector<4x8xf32> to vector<1x8xf32>
    %72 = vector.broadcast %71 : vector<1x8xf32> to vector<8x8xf32>
    %73 = arith.addf %70, %72 : vector<8x8xf32>
    %cst_5 = arith.constant 0.000000e+00 : f32
    %74 = vector.broadcast %cst_5 : f32 to vector<8x8xf32>
    %75 = arith.maximumf %73, %74 : vector<8x8xf32>
    %76 = vector.extract_strided_slice %1 {offsets = [0, 0], sizes = [1, 8], strides = [1, 1]} : vector<4x8xf32> to vector<1x8xf32>
    %77 = vector.broadcast %5 : vector<8x1xf32> to vector<8x8xf32>
    %78 = vector.broadcast %76 : vector<1x8xf32> to vector<8x8xf32>
    %79 = arith.mulf %77, %78 : vector<8x8xf32>
    %80 = vector.extract_strided_slice %1 {offsets = [1, 0], sizes = [1, 8], strides = [1, 1]} : vector<4x8xf32> to vector<1x8xf32>
    %81 = vector.broadcast %6 : vector<8x1xf32> to vector<8x8xf32>
    %82 = vector.broadcast %80 : vector<1x8xf32> to vector<8x8xf32>
    %83 = arith.mulf %81, %82 : vector<8x8xf32>
    %84 = arith.addf %79, %83 : vector<8x8xf32>
    %85 = vector.extract_strided_slice %1 {offsets = [2, 0], sizes = [1, 8], strides = [1, 1]} : vector<4x8xf32> to vector<1x8xf32>
    %86 = vector.broadcast %7 : vector<8x1xf32> to vector<8x8xf32>
    %87 = vector.broadcast %85 : vector<1x8xf32> to vector<8x8xf32>
    %88 = arith.mulf %86, %87 : vector<8x8xf32>
    %89 = arith.addf %84, %88 : vector<8x8xf32>
    %90 = vector.extract_strided_slice %1 {offsets = [3, 0], sizes = [1, 8], strides = [1, 1]} : vector<4x8xf32> to vector<1x8xf32>
    %91 = vector.broadcast %90 : vector<1x8xf32> to vector<8x8xf32>
    %92 = arith.addf %89, %91 : vector<8x8xf32>
    %cst_6 = arith.constant 0.000000e+00 : f32
    %93 = vector.broadcast %cst_6 : f32 to vector<8x8xf32>
    %94 = arith.maximumf %92, %93 : vector<8x8xf32>
    %95 = vector.extract_strided_slice %1 {offsets = [0, 0], sizes = [1, 8], strides = [1, 1]} : vector<4x8xf32> to vector<1x8xf32>
    %96 = vector.broadcast %6 : vector<8x1xf32> to vector<8x8xf32>
    %97 = vector.broadcast %95 : vector<1x8xf32> to vector<8x8xf32>
    %98 = arith.mulf %96, %97 : vector<8x8xf32>
    %99 = vector.extract_strided_slice %1 {offsets = [1, 0], sizes = [1, 8], strides = [1, 1]} : vector<4x8xf32> to vector<1x8xf32>
    %100 = vector.broadcast %7 : vector<8x1xf32> to vector<8x8xf32>
    %101 = vector.broadcast %99 : vector<1x8xf32> to vector<8x8xf32>
    %102 = arith.mulf %100, %101 : vector<8x8xf32>
    %103 = arith.addf %98, %102 : vector<8x8xf32>
    %104 = vector.extract_strided_slice %1 {offsets = [2, 0], sizes = [1, 8], strides = [1, 1]} : vector<4x8xf32> to vector<1x8xf32>
    %105 = vector.broadcast %8 : vector<8x1xf32> to vector<8x8xf32>
    %106 = vector.broadcast %104 : vector<1x8xf32> to vector<8x8xf32>
    %107 = arith.mulf %105, %106 : vector<8x8xf32>
    %108 = arith.addf %103, %107 : vector<8x8xf32>
    %109 = vector.extract_strided_slice %1 {offsets = [3, 0], sizes = [1, 8], strides = [1, 1]} : vector<4x8xf32> to vector<1x8xf32>
    %110 = vector.broadcast %109 : vector<1x8xf32> to vector<8x8xf32>
    %111 = arith.addf %108, %110 : vector<8x8xf32>
    %cst_7 = arith.constant 0.000000e+00 : f32
    %112 = vector.broadcast %cst_7 : f32 to vector<8x8xf32>
    %113 = arith.maximumf %111, %112 : vector<8x8xf32>
    %114 = vector.extract_strided_slice %1 {offsets = [0, 0], sizes = [1, 8], strides = [1, 1]} : vector<4x8xf32> to vector<1x8xf32>
    %115 = vector.broadcast %7 : vector<8x1xf32> to vector<8x8xf32>
    %116 = vector.broadcast %114 : vector<1x8xf32> to vector<8x8xf32>
    %117 = arith.mulf %115, %116 : vector<8x8xf32>
    %118 = vector.extract_strided_slice %1 {offsets = [1, 0], sizes = [1, 8], strides = [1, 1]} : vector<4x8xf32> to vector<1x8xf32>
    %119 = vector.broadcast %8 : vector<8x1xf32> to vector<8x8xf32>
    %120 = vector.broadcast %118 : vector<1x8xf32> to vector<8x8xf32>
    %121 = arith.mulf %119, %120 : vector<8x8xf32>
    %122 = arith.addf %117, %121 : vector<8x8xf32>
    %123 = vector.extract_strided_slice %1 {offsets = [2, 0], sizes = [1, 8], strides = [1, 1]} : vector<4x8xf32> to vector<1x8xf32>
    %124 = vector.broadcast %9 : vector<8x1xf32> to vector<8x8xf32>
    %125 = vector.broadcast %123 : vector<1x8xf32> to vector<8x8xf32>
    %126 = arith.mulf %124, %125 : vector<8x8xf32>
    %127 = arith.addf %122, %126 : vector<8x8xf32>
    %128 = vector.extract_strided_slice %1 {offsets = [3, 0], sizes = [1, 8], strides = [1, 1]} : vector<4x8xf32> to vector<1x8xf32>
    %129 = vector.broadcast %128 : vector<1x8xf32> to vector<8x8xf32>
    %130 = arith.addf %127, %129 : vector<8x8xf32>
    %cst_8 = arith.constant 0.000000e+00 : f32
    %131 = vector.broadcast %cst_8 : f32 to vector<8x8xf32>
    %132 = arith.maximumf %130, %131 : vector<8x8xf32>
    %133 = vector.extract_strided_slice %1 {offsets = [0, 0], sizes = [1, 8], strides = [1, 1]} : vector<4x8xf32> to vector<1x8xf32>
    %134 = vector.broadcast %8 : vector<8x1xf32> to vector<8x8xf32>
    %135 = vector.broadcast %133 : vector<1x8xf32> to vector<8x8xf32>
    %136 = arith.mulf %134, %135 : vector<8x8xf32>
    %137 = vector.extract_strided_slice %1 {offsets = [1, 0], sizes = [1, 8], strides = [1, 1]} : vector<4x8xf32> to vector<1x8xf32>
    %138 = vector.broadcast %9 : vector<8x1xf32> to vector<8x8xf32>
    %139 = vector.broadcast %137 : vector<1x8xf32> to vector<8x8xf32>
    %140 = arith.mulf %138, %139 : vector<8x8xf32>
    %141 = arith.addf %136, %140 : vector<8x8xf32>
    %142 = vector.extract_strided_slice %1 {offsets = [2, 0], sizes = [1, 8], strides = [1, 1]} : vector<4x8xf32> to vector<1x8xf32>
    %143 = vector.broadcast %10 : vector<8x1xf32> to vector<8x8xf32>
    %144 = vector.broadcast %142 : vector<1x8xf32> to vector<8x8xf32>
    %145 = arith.mulf %143, %144 : vector<8x8xf32>
    %146 = arith.addf %141, %145 : vector<8x8xf32>
    %147 = vector.extract_strided_slice %1 {offsets = [3, 0], sizes = [1, 8], strides = [1, 1]} : vector<4x8xf32> to vector<1x8xf32>
    %148 = vector.broadcast %147 : vector<1x8xf32> to vector<8x8xf32>
    %149 = arith.addf %146, %148 : vector<8x8xf32>
    %cst_9 = arith.constant 0.000000e+00 : f32
    %150 = vector.broadcast %cst_9 : f32 to vector<8x8xf32>
    %151 = arith.maximumf %149, %150 : vector<8x8xf32>
    %152 = vector.extract_strided_slice %1 {offsets = [0, 0], sizes = [1, 8], strides = [1, 1]} : vector<4x8xf32> to vector<1x8xf32>
    %153 = vector.broadcast %9 : vector<8x1xf32> to vector<8x8xf32>
    %154 = vector.broadcast %152 : vector<1x8xf32> to vector<8x8xf32>
    %155 = arith.mulf %153, %154 : vector<8x8xf32>
    %156 = vector.extract_strided_slice %1 {offsets = [1, 0], sizes = [1, 8], strides = [1, 1]} : vector<4x8xf32> to vector<1x8xf32>
    %157 = vector.broadcast %10 : vector<8x1xf32> to vector<8x8xf32>
    %158 = vector.broadcast %156 : vector<1x8xf32> to vector<8x8xf32>
    %159 = arith.mulf %157, %158 : vector<8x8xf32>
    %160 = arith.addf %155, %159 : vector<8x8xf32>
    %161 = vector.extract_strided_slice %1 {offsets = [2, 0], sizes = [1, 8], strides = [1, 1]} : vector<4x8xf32> to vector<1x8xf32>
    %162 = vector.broadcast %11 : vector<8x1xf32> to vector<8x8xf32>
    %163 = vector.broadcast %161 : vector<1x8xf32> to vector<8x8xf32>
    %164 = arith.mulf %162, %163 : vector<8x8xf32>
    %165 = arith.addf %160, %164 : vector<8x8xf32>
    %166 = vector.extract_strided_slice %1 {offsets = [3, 0], sizes = [1, 8], strides = [1, 1]} : vector<4x8xf32> to vector<1x8xf32>
    %167 = vector.broadcast %166 : vector<1x8xf32> to vector<8x8xf32>
    %168 = arith.addf %165, %167 : vector<8x8xf32>
    %cst_10 = arith.constant 0.000000e+00 : f32
    %169 = vector.broadcast %cst_10 : f32 to vector<8x8xf32>
    %170 = arith.maximumf %168, %169 : vector<8x8xf32>
    %171 = vector.extract_strided_slice %1 {offsets = [0, 0], sizes = [1, 8], strides = [1, 1]} : vector<4x8xf32> to vector<1x8xf32>
    %172 = vector.broadcast %10 : vector<8x1xf32> to vector<8x8xf32>
    %173 = vector.broadcast %171 : vector<1x8xf32> to vector<8x8xf32>
    %174 = arith.mulf %172, %173 : vector<8x8xf32>
    %175 = vector.extract_strided_slice %1 {offsets = [1, 0], sizes = [1, 8], strides = [1, 1]} : vector<4x8xf32> to vector<1x8xf32>
    %176 = vector.broadcast %11 : vector<8x1xf32> to vector<8x8xf32>
    %177 = vector.broadcast %175 : vector<1x8xf32> to vector<8x8xf32>
    %178 = arith.mulf %176, %177 : vector<8x8xf32>
    %179 = arith.addf %174, %178 : vector<8x8xf32>
    %180 = vector.extract_strided_slice %1 {offsets = [2, 0], sizes = [1, 8], strides = [1, 1]} : vector<4x8xf32> to vector<1x8xf32>
    %181 = vector.broadcast %12 : vector<8x1xf32> to vector<8x8xf32>
    %182 = vector.broadcast %180 : vector<1x8xf32> to vector<8x8xf32>
    %183 = arith.mulf %181, %182 : vector<8x8xf32>
    %184 = arith.addf %179, %183 : vector<8x8xf32>
    %185 = vector.extract_strided_slice %1 {offsets = [3, 0], sizes = [1, 8], strides = [1, 1]} : vector<4x8xf32> to vector<1x8xf32>
    %186 = vector.broadcast %185 : vector<1x8xf32> to vector<8x8xf32>
    %187 = arith.addf %184, %186 : vector<8x8xf32>
    %cst_11 = arith.constant 0.000000e+00 : f32
    %188 = vector.broadcast %cst_11 : f32 to vector<8x8xf32>
    %189 = arith.maximumf %187, %188 : vector<8x8xf32>
    %190 = vector.extract_strided_slice %1 {offsets = [0, 0], sizes = [1, 8], strides = [1, 1]} : vector<4x8xf32> to vector<1x8xf32>
    %191 = vector.broadcast %11 : vector<8x1xf32> to vector<8x8xf32>
    %192 = vector.broadcast %190 : vector<1x8xf32> to vector<8x8xf32>
    %193 = arith.mulf %191, %192 : vector<8x8xf32>
    %194 = vector.extract_strided_slice %1 {offsets = [1, 0], sizes = [1, 8], strides = [1, 1]} : vector<4x8xf32> to vector<1x8xf32>
    %195 = vector.broadcast %12 : vector<8x1xf32> to vector<8x8xf32>
    %196 = vector.broadcast %194 : vector<1x8xf32> to vector<8x8xf32>
    %197 = arith.mulf %195, %196 : vector<8x8xf32>
    %198 = arith.addf %193, %197 : vector<8x8xf32>
    %199 = vector.extract_strided_slice %1 {offsets = [2, 0], sizes = [1, 8], strides = [1, 1]} : vector<4x8xf32> to vector<1x8xf32>
    %200 = vector.broadcast %13 : vector<8x1xf32> to vector<8x8xf32>
    %201 = vector.broadcast %199 : vector<1x8xf32> to vector<8x8xf32>
    %202 = arith.mulf %200, %201 : vector<8x8xf32>
    %203 = arith.addf %198, %202 : vector<8x8xf32>
    %204 = vector.extract_strided_slice %1 {offsets = [3, 0], sizes = [1, 8], strides = [1, 1]} : vector<4x8xf32> to vector<1x8xf32>
    %205 = vector.broadcast %204 : vector<1x8xf32> to vector<8x8xf32>
    %206 = arith.addf %203, %205 : vector<8x8xf32>
    %cst_12 = arith.constant 0.000000e+00 : f32
    %207 = vector.broadcast %cst_12 : f32 to vector<8x8xf32>
    %208 = arith.maximumf %206, %207 : vector<8x8xf32>
    %209 = vector.extract_strided_slice %1 {offsets = [0, 0], sizes = [1, 8], strides = [1, 1]} : vector<4x8xf32> to vector<1x8xf32>
    %210 = vector.broadcast %12 : vector<8x1xf32> to vector<8x8xf32>
    %211 = vector.broadcast %209 : vector<1x8xf32> to vector<8x8xf32>
    %212 = arith.mulf %210, %211 : vector<8x8xf32>
    %213 = vector.extract_strided_slice %1 {offsets = [1, 0], sizes = [1, 8], strides = [1, 1]} : vector<4x8xf32> to vector<1x8xf32>
    %214 = vector.broadcast %13 : vector<8x1xf32> to vector<8x8xf32>
    %215 = vector.broadcast %213 : vector<1x8xf32> to vector<8x8xf32>
    %216 = arith.mulf %214, %215 : vector<8x8xf32>
    %217 = arith.addf %212, %216 : vector<8x8xf32>
    %218 = vector.extract_strided_slice %1 {offsets = [2, 0], sizes = [1, 8], strides = [1, 1]} : vector<4x8xf32> to vector<1x8xf32>
    %219 = vector.broadcast %14 : vector<8x1xf32> to vector<8x8xf32>
    %220 = vector.broadcast %218 : vector<1x8xf32> to vector<8x8xf32>
    %221 = arith.mulf %219, %220 : vector<8x8xf32>
    %222 = arith.addf %217, %221 : vector<8x8xf32>
    %223 = vector.extract_strided_slice %1 {offsets = [3, 0], sizes = [1, 8], strides = [1, 1]} : vector<4x8xf32> to vector<1x8xf32>
    %224 = vector.broadcast %223 : vector<1x8xf32> to vector<8x8xf32>
    %225 = arith.addf %222, %224 : vector<8x8xf32>
    %cst_13 = arith.constant 0.000000e+00 : f32
    %226 = vector.broadcast %cst_13 : f32 to vector<8x8xf32>
    %227 = arith.maximumf %225, %226 : vector<8x8xf32>
    %228 = vector.extract_strided_slice %1 {offsets = [0, 0], sizes = [1, 8], strides = [1, 1]} : vector<4x8xf32> to vector<1x8xf32>
    %229 = vector.broadcast %13 : vector<8x1xf32> to vector<8x8xf32>
    %230 = vector.broadcast %228 : vector<1x8xf32> to vector<8x8xf32>
    %231 = arith.mulf %229, %230 : vector<8x8xf32>
    %232 = vector.extract_strided_slice %1 {offsets = [1, 0], sizes = [1, 8], strides = [1, 1]} : vector<4x8xf32> to vector<1x8xf32>
    %233 = vector.broadcast %14 : vector<8x1xf32> to vector<8x8xf32>
    %234 = vector.broadcast %232 : vector<1x8xf32> to vector<8x8xf32>
    %235 = arith.mulf %233, %234 : vector<8x8xf32>
    %236 = arith.addf %231, %235 : vector<8x8xf32>
    %237 = vector.extract_strided_slice %1 {offsets = [2, 0], sizes = [1, 8], strides = [1, 1]} : vector<4x8xf32> to vector<1x8xf32>
    %238 = vector.broadcast %15 : vector<8x1xf32> to vector<8x8xf32>
    %239 = vector.broadcast %237 : vector<1x8xf32> to vector<8x8xf32>
    %240 = arith.mulf %238, %239 : vector<8x8xf32>
    %241 = arith.addf %236, %240 : vector<8x8xf32>
    %242 = vector.extract_strided_slice %1 {offsets = [3, 0], sizes = [1, 8], strides = [1, 1]} : vector<4x8xf32> to vector<1x8xf32>
    %243 = vector.broadcast %242 : vector<1x8xf32> to vector<8x8xf32>
    %244 = arith.addf %241, %243 : vector<8x8xf32>
    %cst_14 = arith.constant 0.000000e+00 : f32
    %245 = vector.broadcast %cst_14 : f32 to vector<8x8xf32>
    %246 = arith.maximumf %244, %245 : vector<8x8xf32>
    %247 = vector.extract_strided_slice %1 {offsets = [0, 0], sizes = [1, 8], strides = [1, 1]} : vector<4x8xf32> to vector<1x8xf32>
    %248 = vector.broadcast %14 : vector<8x1xf32> to vector<8x8xf32>
    %249 = vector.broadcast %247 : vector<1x8xf32> to vector<8x8xf32>
    %250 = arith.mulf %248, %249 : vector<8x8xf32>
    %251 = vector.extract_strided_slice %1 {offsets = [1, 0], sizes = [1, 8], strides = [1, 1]} : vector<4x8xf32> to vector<1x8xf32>
    %252 = vector.broadcast %15 : vector<8x1xf32> to vector<8x8xf32>
    %253 = vector.broadcast %251 : vector<1x8xf32> to vector<8x8xf32>
    %254 = arith.mulf %252, %253 : vector<8x8xf32>
    %255 = arith.addf %250, %254 : vector<8x8xf32>
    %256 = vector.extract_strided_slice %1 {offsets = [2, 0], sizes = [1, 8], strides = [1, 1]} : vector<4x8xf32> to vector<1x8xf32>
    %257 = vector.broadcast %16 : vector<8x1xf32> to vector<8x8xf32>
    %258 = vector.broadcast %256 : vector<1x8xf32> to vector<8x8xf32>
    %259 = arith.mulf %257, %258 : vector<8x8xf32>
    %260 = arith.addf %255, %259 : vector<8x8xf32>
    %261 = vector.extract_strided_slice %1 {offsets = [3, 0], sizes = [1, 8], strides = [1, 1]} : vector<4x8xf32> to vector<1x8xf32>
    %262 = vector.broadcast %261 : vector<1x8xf32> to vector<8x8xf32>
    %263 = arith.addf %260, %262 : vector<8x8xf32>
    %cst_15 = arith.constant 0.000000e+00 : f32
    %264 = vector.broadcast %cst_15 : f32 to vector<8x8xf32>
    %265 = arith.maximumf %263, %264 : vector<8x8xf32>
    %266 = vector.extract_strided_slice %1 {offsets = [0, 0], sizes = [1, 8], strides = [1, 1]} : vector<4x8xf32> to vector<1x8xf32>
    %267 = vector.broadcast %15 : vector<8x1xf32> to vector<8x8xf32>
    %268 = vector.broadcast %266 : vector<1x8xf32> to vector<8x8xf32>
    %269 = arith.mulf %267, %268 : vector<8x8xf32>
    %270 = vector.extract_strided_slice %1 {offsets = [1, 0], sizes = [1, 8], strides = [1, 1]} : vector<4x8xf32> to vector<1x8xf32>
    %271 = vector.broadcast %16 : vector<8x1xf32> to vector<8x8xf32>
    %272 = vector.broadcast %270 : vector<1x8xf32> to vector<8x8xf32>
    %273 = arith.mulf %271, %272 : vector<8x8xf32>
    %274 = arith.addf %269, %273 : vector<8x8xf32>
    %275 = vector.extract_strided_slice %1 {offsets = [2, 0], sizes = [1, 8], strides = [1, 1]} : vector<4x8xf32> to vector<1x8xf32>
    %276 = vector.broadcast %17 : vector<8x1xf32> to vector<8x8xf32>
    %277 = vector.broadcast %275 : vector<1x8xf32> to vector<8x8xf32>
    %278 = arith.mulf %276, %277 : vector<8x8xf32>
    %279 = arith.addf %274, %278 : vector<8x8xf32>
    %280 = vector.extract_strided_slice %1 {offsets = [3, 0], sizes = [1, 8], strides = [1, 1]} : vector<4x8xf32> to vector<1x8xf32>
    %281 = vector.broadcast %280 : vector<1x8xf32> to vector<8x8xf32>
    %282 = arith.addf %279, %281 : vector<8x8xf32>
    %cst_16 = arith.constant 0.000000e+00 : f32
    %283 = vector.broadcast %cst_16 : f32 to vector<8x8xf32>
    %284 = arith.maximumf %282, %283 : vector<8x8xf32>
    %285 = vector.extract_strided_slice %1 {offsets = [0, 0], sizes = [1, 8], strides = [1, 1]} : vector<4x8xf32> to vector<1x8xf32>
    %286 = vector.broadcast %16 : vector<8x1xf32> to vector<8x8xf32>
    %287 = vector.broadcast %285 : vector<1x8xf32> to vector<8x8xf32>
    %288 = arith.mulf %286, %287 : vector<8x8xf32>
    %289 = vector.extract_strided_slice %1 {offsets = [1, 0], sizes = [1, 8], strides = [1, 1]} : vector<4x8xf32> to vector<1x8xf32>
    %290 = vector.broadcast %17 : vector<8x1xf32> to vector<8x8xf32>
    %291 = vector.broadcast %289 : vector<1x8xf32> to vector<8x8xf32>
    %292 = arith.mulf %290, %291 : vector<8x8xf32>
    %293 = arith.addf %288, %292 : vector<8x8xf32>
    %294 = vector.extract_strided_slice %1 {offsets = [2, 0], sizes = [1, 8], strides = [1, 1]} : vector<4x8xf32> to vector<1x8xf32>
    %295 = vector.broadcast %18 : vector<8x1xf32> to vector<8x8xf32>
    %296 = vector.broadcast %294 : vector<1x8xf32> to vector<8x8xf32>
    %297 = arith.mulf %295, %296 : vector<8x8xf32>
    %298 = arith.addf %293, %297 : vector<8x8xf32>
    %299 = vector.extract_strided_slice %1 {offsets = [3, 0], sizes = [1, 8], strides = [1, 1]} : vector<4x8xf32> to vector<1x8xf32>
    %300 = vector.broadcast %299 : vector<1x8xf32> to vector<8x8xf32>
    %301 = arith.addf %298, %300 : vector<8x8xf32>
    %cst_17 = arith.constant 0.000000e+00 : f32
    %302 = vector.broadcast %cst_17 : f32 to vector<8x8xf32>
    %303 = arith.maximumf %301, %302 : vector<8x8xf32>
    %304 = vector.extract_strided_slice %1 {offsets = [0, 0], sizes = [1, 8], strides = [1, 1]} : vector<4x8xf32> to vector<1x8xf32>
    %305 = vector.broadcast %17 : vector<8x1xf32> to vector<8x8xf32>
    %306 = vector.broadcast %304 : vector<1x8xf32> to vector<8x8xf32>
    %307 = arith.mulf %305, %306 : vector<8x8xf32>
    %308 = vector.extract_strided_slice %1 {offsets = [1, 0], sizes = [1, 8], strides = [1, 1]} : vector<4x8xf32> to vector<1x8xf32>
    %309 = vector.broadcast %18 : vector<8x1xf32> to vector<8x8xf32>
    %310 = vector.broadcast %308 : vector<1x8xf32> to vector<8x8xf32>
    %311 = arith.mulf %309, %310 : vector<8x8xf32>
    %312 = arith.addf %307, %311 : vector<8x8xf32>
    %313 = vector.extract_strided_slice %1 {offsets = [2, 0], sizes = [1, 8], strides = [1, 1]} : vector<4x8xf32> to vector<1x8xf32>
    %314 = vector.broadcast %2 : vector<8x1xf32> to vector<8x8xf32>
    %315 = vector.broadcast %313 : vector<1x8xf32> to vector<8x8xf32>
    %316 = arith.mulf %314, %315 : vector<8x8xf32>
    %317 = arith.addf %312, %316 : vector<8x8xf32>
    %318 = vector.extract_strided_slice %1 {offsets = [3, 0], sizes = [1, 8], strides = [1, 1]} : vector<4x8xf32> to vector<1x8xf32>
    %319 = vector.broadcast %318 : vector<1x8xf32> to vector<8x8xf32>
    %320 = arith.addf %317, %319 : vector<8x8xf32>
    %cst_18 = arith.constant 0.000000e+00 : f32
    %321 = vector.broadcast %cst_18 : f32 to vector<8x8xf32>
    %322 = arith.maximumf %320, %321 : vector<8x8xf32>
    %323 = arith.maximumf %37, %56 : vector<8x8xf32>
    %324 = arith.maximumf %75, %94 : vector<8x8xf32>
    %325 = arith.maximumf %113, %132 : vector<8x8xf32>
    %326 = arith.maximumf %151, %170 : vector<8x8xf32>
    %327 = arith.maximumf %189, %208 : vector<8x8xf32>
    %328 = arith.maximumf %227, %246 : vector<8x8xf32>
    %329 = arith.maximumf %265, %284 : vector<8x8xf32>
    %330 = arith.maximumf %303, %322 : vector<8x8xf32>
    %cst_19 = arith.constant 0.000000e+00 : f32
    %331 = vector.broadcast %cst_19 : f32 to vector<8x8xf32>
    %332 = tpu.concatenate %323, %324, %325, %326, %327, %328, %329, %330 in 0 : vector<8x8xf32>, vector<8x8xf32>, vector<8x8xf32>, vector<8x8xf32>, vector<8x8xf32>, vector<8x8xf32>, vector<8x8xf32>, vector<8x8xf32> -> vector<64x8xf32>
    %333 = tpu.concatenate %331, %323, %324, %325, %326, %327, %328, %329 in 0 : vector<8x8xf32>, vector<8x8xf32>, vector<8x8xf32>, vector<8x8xf32>, vector<8x8xf32>, vector<8x8xf32>, vector<8x8xf32>, vector<8x8xf32> -> vector<64x8xf32>
    %334 = tpu.concatenate %324, %325, %326, %327, %328, %329, %330, %331 in 0 : vector<8x8xf32>, vector<8x8xf32>, vector<8x8xf32>, vector<8x8xf32>, vector<8x8xf32>, vector<8x8xf32>, vector<8x8xf32>, vector<8x8xf32> -> vector<64x8xf32>
    %c8 = arith.constant 8 : index
    %c0_20 = arith.constant 0 : index
    %335 = vector.load %arg2[%c8, %c0_20] : memref<264x128xf32, #tpu.memory_space<vmem>>, vector<25x8xf32>
    %336 = vector.extract_strided_slice %335 {offsets = [0, 0], sizes = [8, 8], strides = [1, 1]} : vector<25x8xf32> to vector<8x8xf32>
    %cst_21 = arith.constant dense<0.000000e+00> : vector<64x8xf32>
    %337 = tpu.matmul %333, %336, %cst_21 {dimension_numbers = #tpu.dot_dimension_numbers<[1], [0], [0], [1], [0, 0, 1, 1], [], []>} : vector<64x8xf32>, vector<8x8xf32>, vector<64x8xf32> -> vector<64x8xf32>
    %338 = vector.extract_strided_slice %335 {offsets = [8, 0], sizes = [8, 8], strides = [1, 1]} : vector<25x8xf32> to vector<8x8xf32>
    %cst_22 = arith.constant dense<0.000000e+00> : vector<64x8xf32>
    %339 = tpu.matmul %332, %338, %cst_22 {dimension_numbers = #tpu.dot_dimension_numbers<[1], [0], [0], [1], [0, 0, 1, 1], [], []>} : vector<64x8xf32>, vector<8x8xf32>, vector<64x8xf32> -> vector<64x8xf32>
    %340 = arith.addf %337, %339 : vector<64x8xf32>
    %341 = vector.extract_strided_slice %335 {offsets = [16, 0], sizes = [8, 8], strides = [1, 1]} : vector<25x8xf32> to vector<8x8xf32>
    %cst_23 = arith.constant dense<0.000000e+00> : vector<64x8xf32>
    %342 = tpu.matmul %334, %341, %cst_23 {dimension_numbers = #tpu.dot_dimension_numbers<[1], [0], [0], [1], [0, 0, 1, 1], [], []>} : vector<64x8xf32>, vector<8x8xf32>, vector<64x8xf32> -> vector<64x8xf32>
    %343 = arith.addf %340, %342 : vector<64x8xf32>
    %344 = vector.extract_strided_slice %335 {offsets = [24, 0], sizes = [1, 8], strides = [1, 1]} : vector<25x8xf32> to vector<1x8xf32>
    %345 = vector.broadcast %344 : vector<1x8xf32> to vector<64x8xf32>
    %346 = arith.addf %343, %345 : vector<64x8xf32>
    %cst_24 = arith.constant 0.000000e+00 : f32
    %347 = vector.broadcast %cst_24 : f32 to vector<64x8xf32>
    %348 = arith.maximumf %346, %347 : vector<64x8xf32>
    %349 = vector.extract_strided_slice %348 {offsets = [0, 0], sizes = [8, 8], strides = [1, 1]} : vector<64x8xf32> to vector<8x8xf32>
    %350 = vector.extract_strided_slice %348 {offsets = [8, 0], sizes = [8, 8], strides = [1, 1]} : vector<64x8xf32> to vector<8x8xf32>
    %351 = arith.maximumf %349, %350 : vector<8x8xf32>
    %352 = vector.extract_strided_slice %348 {offsets = [16, 0], sizes = [8, 8], strides = [1, 1]} : vector<64x8xf32> to vector<8x8xf32>
    %353 = vector.extract_strided_slice %348 {offsets = [24, 0], sizes = [8, 8], strides = [1, 1]} : vector<64x8xf32> to vector<8x8xf32>
    %354 = arith.maximumf %352, %353 : vector<8x8xf32>
    %355 = vector.extract_strided_slice %348 {offsets = [32, 0], sizes = [8, 8], strides = [1, 1]} : vector<64x8xf32> to vector<8x8xf32>
    %356 = vector.extract_strided_slice %348 {offsets = [40, 0], sizes = [8, 8], strides = [1, 1]} : vector<64x8xf32> to vector<8x8xf32>
    %357 = arith.maximumf %355, %356 : vector<8x8xf32>
    %358 = vector.extract_strided_slice %348 {offsets = [48, 0], sizes = [8, 8], strides = [1, 1]} : vector<64x8xf32> to vector<8x8xf32>
    %359 = vector.extract_strided_slice %348 {offsets = [56, 0], sizes = [8, 8], strides = [1, 1]} : vector<64x8xf32> to vector<8x8xf32>
    %360 = arith.maximumf %358, %359 : vector<8x8xf32>
    %c40 = arith.constant 40 : index
    %c0_25 = arith.constant 0 : index
    %361 = vector.load %arg2[%c40, %c0_25] : memref<264x128xf32, #tpu.memory_space<vmem>>, vector<8x32xf32>
    %c48 = arith.constant 48 : index
    %c0_26 = arith.constant 0 : index
    %362 = vector.load %arg2[%c48, %c0_26] : memref<264x128xf32, #tpu.memory_space<vmem>>, vector<8x32xf32>
    %cst_27 = arith.constant dense<0.000000e+00> : vector<8x32xf32>
    %363 = tpu.matmul %351, %362, %cst_27 {dimension_numbers = #tpu.dot_dimension_numbers<[1], [0], [0], [1], [0, 0, 1, 1], [], []>} : vector<8x8xf32>, vector<8x32xf32>, vector<8x32xf32> -> vector<8x32xf32>
    %364 = arith.addf %361, %363 : vector<8x32xf32>
    %c56 = arith.constant 56 : index
    %c0_28 = arith.constant 0 : index
    %365 = vector.load %arg2[%c56, %c0_28] : memref<264x128xf32, #tpu.memory_space<vmem>>, vector<8x32xf32>
    %cst_29 = arith.constant dense<0.000000e+00> : vector<8x32xf32>
    %366 = tpu.matmul %354, %365, %cst_29 {dimension_numbers = #tpu.dot_dimension_numbers<[1], [0], [0], [1], [0, 0, 1, 1], [], []>} : vector<8x8xf32>, vector<8x32xf32>, vector<8x32xf32> -> vector<8x32xf32>
    %367 = arith.addf %364, %366 : vector<8x32xf32>
    %c64 = arith.constant 64 : index
    %c0_30 = arith.constant 0 : index
    %368 = vector.load %arg2[%c64, %c0_30] : memref<264x128xf32, #tpu.memory_space<vmem>>, vector<8x32xf32>
    %cst_31 = arith.constant dense<0.000000e+00> : vector<8x32xf32>
    %369 = tpu.matmul %357, %368, %cst_31 {dimension_numbers = #tpu.dot_dimension_numbers<[1], [0], [0], [1], [0, 0, 1, 1], [], []>} : vector<8x8xf32>, vector<8x32xf32>, vector<8x32xf32> -> vector<8x32xf32>
    %370 = arith.addf %367, %369 : vector<8x32xf32>
    %c72 = arith.constant 72 : index
    %c0_32 = arith.constant 0 : index
    %371 = vector.load %arg2[%c72, %c0_32] : memref<264x128xf32, #tpu.memory_space<vmem>>, vector<8x32xf32>
    %cst_33 = arith.constant dense<0.000000e+00> : vector<8x32xf32>
    %372 = tpu.matmul %360, %371, %cst_33 {dimension_numbers = #tpu.dot_dimension_numbers<[1], [0], [0], [1], [0, 0, 1, 1], [], []>} : vector<8x8xf32>, vector<8x32xf32>, vector<8x32xf32> -> vector<8x32xf32>
    %373 = arith.addf %370, %372 : vector<8x32xf32>
    %cst_34 = arith.constant dense<0.000000e+00> : vector<8x8xf32>
    %374 = tpu.matmul %373, %373, %cst_34 {dimension_numbers = #tpu.dot_dimension_numbers<[1], [1], [0], [0], [0, 0, 1, 0], [], []>} : vector<8x32xf32>, vector<8x32xf32>, vector<8x8xf32> -> vector<8x8xf32>
    %cst_35 = arith.constant 0.000000e+00 : f32
    %375 = vector.broadcast %cst_35 : f32 to vector<8x8xf32>
    %376 = arith.maximumf %374, %375 : vector<8x8xf32>
    %cst_36 = arith.constant 0.699999988 : f32
    %377 = vector.broadcast %cst_36 : f32 to vector<8x8xf32>
    %378 = arith.mulf %376, %377 : vector<8x8xf32>
    %379 = tpu.iota {dimensions = array<i32: 0>} : vector<8x8xi32>
    %380 = tpu.iota {dimensions = array<i32: 1>} : vector<8x8xi32>
    %c-4_i32 = arith.constant -4 : i32
    %381 = vector.broadcast %c-4_i32 : i32 to vector<8x8xi32>
    %382 = arith.andi %379, %381 : vector<8x8xi32>
    %c-4_i32_37 = arith.constant -4 : i32
    %383 = vector.broadcast %c-4_i32_37 : i32 to vector<8x8xi32>
    %384 = arith.andi %380, %383 : vector<8x8xi32>
    %385 = arith.cmpi eq, %382, %384 : vector<8x8xi32>
    %cst_38 = arith.constant -1.000000e+30 : f32
    %386 = vector.broadcast %cst_38 : f32 to vector<8x8xf32>
    %387 = arith.select %385, %378, %386 : vector<8x8xi1>, vector<8x8xf32>
    %cst_39 = arith.constant dense<0xFF800000> : vector<8xf32>
    %388 = vector.multi_reduction <maximumf>, %387, %cst_39 [1] : vector<8x8xf32> to vector<8xf32>
    %389 = vector.shape_cast %388 : vector<8xf32> to vector<8x1xf32>
    %390 = vector.broadcast %389 : vector<8x1xf32> to vector<8x8xf32>
    %391 = arith.subf %387, %390 : vector<8x8xf32>
    %392 = math.exp %391 : vector<8x8xf32>
    %cst_40 = arith.constant dense<0.000000e+00> : vector<8xf32>
    %393 = vector.multi_reduction <add>, %392, %cst_40 [1] : vector<8x8xf32> to vector<8xf32>
    %394 = vector.shape_cast %393 : vector<8xf32> to vector<8x1xf32>
    %395 = vector.broadcast %394 : vector<8x1xf32> to vector<8x8xf32>
    %396 = arith.divf %392, %395 : vector<8x8xf32>
    %cst_41 = arith.constant dense<0.000000e+00> : vector<8x32xf32>
    %397 = tpu.matmul %396, %373, %cst_41 {dimension_numbers = #tpu.dot_dimension_numbers<[1], [0], [0], [1], [0, 0, 1, 1], [], []>} : vector<8x8xf32>, vector<8x32xf32>, vector<8x32xf32> -> vector<8x32xf32>
    %c80 = arith.constant 80 : index
    %c0_42 = arith.constant 0 : index
    %398 = vector.load %arg2[%c80, %c0_42] : memref<264x128xf32, #tpu.memory_space<vmem>>, vector<32x32xf32>
    %cst_43 = arith.constant dense<0.000000e+00> : vector<8x32xf32>
    %399 = tpu.matmul %397, %398, %cst_43 {dimension_numbers = #tpu.dot_dimension_numbers<[1], [0], [0], [1], [0, 0, 1, 1], [], []>} : vector<8x32xf32>, vector<32x32xf32>, vector<8x32xf32> -> vector<8x32xf32>
    %c112 = arith.constant 112 : index
    %c0_44 = arith.constant 0 : index
    %400 = vector.load %arg2[%c112, %c0_44] : memref<264x128xf32, #tpu.memory_space<vmem>>, vector<1x32xf32>
    %401 = vector.broadcast %400 : vector<1x32xf32> to vector<8x32xf32>
    %402 = arith.addf %399, %401 : vector<8x32xf32>
    %cst_45 = arith.constant 0.000000e+00 : f32
    %403 = vector.broadcast %cst_45 : f32 to vector<8x32xf32>
    %404 = arith.maximumf %402, %403 : vector<8x32xf32>
    %c152 = arith.constant 152 : index
    %c0_46 = arith.constant 0 : index
    %405 = vector.load %arg2[%c152, %c0_46] : memref<264x128xf32, #tpu.memory_space<vmem>>, vector<1x32xf32>
    %406 = vector.extract_strided_slice %404 {offsets = [0, 0], sizes = [1, 32], strides = [1, 1]} : vector<8x32xf32> to vector<1x32xf32>
    %407 = vector.extract_strided_slice %404 {offsets = [4, 0], sizes = [1, 32], strides = [1, 1]} : vector<8x32xf32> to vector<1x32xf32>
    %408 = tpu.concatenate %406, %407 in 0 : vector<1x32xf32>, vector<1x32xf32> -> vector<2x32xf32>
    %c120 = arith.constant 120 : index
    %c0_47 = arith.constant 0 : index
    %409 = vector.load %arg2[%c120, %c0_47] : memref<264x128xf32, #tpu.memory_space<vmem>>, vector<32x32xf32>
    %cst_48 = arith.constant dense<0.000000e+00> : vector<2x32xf32>
    %410 = tpu.matmul %408, %409, %cst_48 {dimension_numbers = #tpu.dot_dimension_numbers<[1], [0], [0], [1], [0, 0, 1, 1], [], []>} : vector<2x32xf32>, vector<32x32xf32>, vector<2x32xf32> -> vector<2x32xf32>
    %411 = vector.broadcast %405 : vector<1x32xf32> to vector<2x32xf32>
    %412 = arith.addf %411, %410 : vector<2x32xf32>
    %413 = vector.extract_strided_slice %404 {offsets = [1, 0], sizes = [1, 32], strides = [1, 1]} : vector<8x32xf32> to vector<1x32xf32>
    %414 = vector.extract_strided_slice %404 {offsets = [5, 0], sizes = [1, 32], strides = [1, 1]} : vector<8x32xf32> to vector<1x32xf32>
    %415 = tpu.concatenate %413, %414 in 0 : vector<1x32xf32>, vector<1x32xf32> -> vector<2x32xf32>
    %c120_49 = arith.constant 120 : index
    %c32 = arith.constant 32 : index
    %416 = vector.load %arg2[%c120_49, %c32] : memref<264x128xf32, #tpu.memory_space<vmem>>, vector<32x32xf32>
    %cst_50 = arith.constant dense<0.000000e+00> : vector<2x32xf32>
    %417 = tpu.matmul %415, %416, %cst_50 {dimension_numbers = #tpu.dot_dimension_numbers<[1], [0], [0], [1], [0, 0, 1, 1], [], []>} : vector<2x32xf32>, vector<32x32xf32>, vector<2x32xf32> -> vector<2x32xf32>
    %418 = arith.addf %412, %417 : vector<2x32xf32>
    %419 = vector.extract_strided_slice %404 {offsets = [2, 0], sizes = [1, 32], strides = [1, 1]} : vector<8x32xf32> to vector<1x32xf32>
    %420 = vector.extract_strided_slice %404 {offsets = [6, 0], sizes = [1, 32], strides = [1, 1]} : vector<8x32xf32> to vector<1x32xf32>
    %421 = tpu.concatenate %419, %420 in 0 : vector<1x32xf32>, vector<1x32xf32> -> vector<2x32xf32>
    %c120_51 = arith.constant 120 : index
    %c64_52 = arith.constant 64 : index
    %422 = vector.load %arg2[%c120_51, %c64_52] : memref<264x128xf32, #tpu.memory_space<vmem>>, vector<32x32xf32>
    %cst_53 = arith.constant dense<0.000000e+00> : vector<2x32xf32>
    %423 = tpu.matmul %421, %422, %cst_53 {dimension_numbers = #tpu.dot_dimension_numbers<[1], [0], [0], [1], [0, 0, 1, 1], [], []>} : vector<2x32xf32>, vector<32x32xf32>, vector<2x32xf32> -> vector<2x32xf32>
    %424 = arith.addf %418, %423 : vector<2x32xf32>
    %425 = vector.extract_strided_slice %404 {offsets = [3, 0], sizes = [1, 32], strides = [1, 1]} : vector<8x32xf32> to vector<1x32xf32>
    %426 = vector.extract_strided_slice %404 {offsets = [7, 0], sizes = [1, 32], strides = [1, 1]} : vector<8x32xf32> to vector<1x32xf32>
    %427 = tpu.concatenate %425, %426 in 0 : vector<1x32xf32>, vector<1x32xf32> -> vector<2x32xf32>
    %c120_54 = arith.constant 120 : index
    %c96 = arith.constant 96 : index
    %428 = vector.load %arg2[%c120_54, %c96] : memref<264x128xf32, #tpu.memory_space<vmem>>, vector<32x32xf32>
    %cst_55 = arith.constant dense<0.000000e+00> : vector<2x32xf32>
    %429 = tpu.matmul %427, %428, %cst_55 {dimension_numbers = #tpu.dot_dimension_numbers<[1], [0], [0], [1], [0, 0, 1, 1], [], []>} : vector<2x32xf32>, vector<32x32xf32>, vector<2x32xf32> -> vector<2x32xf32>
    %430 = arith.addf %424, %429 : vector<2x32xf32>
    %cst_56 = arith.constant 0.000000e+00 : f32
    %431 = vector.broadcast %cst_56 : f32 to vector<2x32xf32>
    %432 = arith.maximumf %430, %431 : vector<2x32xf32>
    %c160 = arith.constant 160 : index
    %c0_57 = arith.constant 0 : index
    %433 = vector.load %arg2[%c160, %c0_57] : memref<264x128xf32, #tpu.memory_space<vmem>>, vector<32x32xf32>
    %cst_58 = arith.constant dense<0.000000e+00> : vector<2x32xf32>
    %434 = tpu.matmul %432, %433, %cst_58 {dimension_numbers = #tpu.dot_dimension_numbers<[1], [0], [0], [1], [0, 0, 1, 1], [], []>} : vector<2x32xf32>, vector<32x32xf32>, vector<2x32xf32> -> vector<2x32xf32>
    %c192 = arith.constant 192 : index
    %c0_59 = arith.constant 0 : index
    %435 = vector.load %arg2[%c192, %c0_59] : memref<264x128xf32, #tpu.memory_space<vmem>>, vector<1x32xf32>
    %436 = vector.broadcast %435 : vector<1x32xf32> to vector<2x32xf32>
    %437 = arith.addf %434, %436 : vector<2x32xf32>
    %cst_60 = arith.constant 0.000000e+00 : f32
    %438 = vector.broadcast %cst_60 : f32 to vector<2x32xf32>
    %439 = arith.maximumf %437, %438 : vector<2x32xf32>
    %c200 = arith.constant 200 : index
    %c0_61 = arith.constant 0 : index
    %440 = vector.load %arg2[%c200, %c0_61] : memref<264x128xf32, #tpu.memory_space<vmem>>, vector<32x16xf32>
    %cst_62 = arith.constant dense<0.000000e+00> : vector<2x16xf32>
    %441 = tpu.matmul %439, %440, %cst_62 {dimension_numbers = #tpu.dot_dimension_numbers<[1], [0], [0], [1], [0, 0, 1, 1], [], []>} : vector<2x32xf32>, vector<32x16xf32>, vector<2x16xf32> -> vector<2x16xf32>
    %c232 = arith.constant 232 : index
    %c0_63 = arith.constant 0 : index
    %442 = vector.load %arg2[%c232, %c0_63] : memref<264x128xf32, #tpu.memory_space<vmem>>, vector<1x16xf32>
    %443 = vector.broadcast %442 : vector<1x16xf32> to vector<2x16xf32>
    %444 = arith.addf %441, %443 : vector<2x16xf32>
    %cst_64 = arith.constant 0.000000e+00 : f32
    %445 = vector.broadcast %cst_64 : f32 to vector<2x16xf32>
    %446 = arith.maximumf %444, %445 : vector<2x16xf32>
    %c240 = arith.constant 240 : index
    %c0_65 = arith.constant 0 : index
    %447 = vector.load %arg2[%c240, %c0_65] : memref<264x128xf32, #tpu.memory_space<vmem>>, vector<16x128xf32>
    %cst_66 = arith.constant dense<0.000000e+00> : vector<2x128xf32>
    %448 = tpu.matmul %446, %447, %cst_66 {dimension_numbers = #tpu.dot_dimension_numbers<[1], [0], [0], [1], [0, 0, 1, 1], [], []>} : vector<2x16xf32>, vector<16x128xf32>, vector<2x128xf32> -> vector<2x128xf32>
    %c256 = arith.constant 256 : index
    %c0_67 = arith.constant 0 : index
    %449 = vector.load %arg2[%c256, %c0_67] : memref<264x128xf32, #tpu.memory_space<vmem>>, vector<1x128xf32>
    %450 = vector.broadcast %449 : vector<1x128xf32> to vector<2x128xf32>
    %451 = arith.addf %448, %450 : vector<2x128xf32>
    %c0_68 = arith.constant 0 : index
    %c0_69 = arith.constant 0 : index
    %452 = vector.load %arg3[%c0_68, %c0_69] : memref<2x128xf32, #tpu.memory_space<vmem>>, vector<2x128xf32>
    tpu.vector_store %arg3[%c0_68, %c0_69], %451 {strides = array<i32>} : memref<2x128xf32, #tpu.memory_space<vmem>>, vector<2x128xf32>,
    return
  }
  func.func @transform_0(%arg0: i32) -> (i32, i32) {
    %c0_i32 = arith.constant 0 : i32
    %c0_i32_0 = arith.constant 0 : i32
    %c0_i32_1 = arith.constant 0 : i32
    return %c0_i32, %c0_i32_0 : i32, i32
  }
  func.func @transform_1(%arg0: i32) -> (i32, i32) {
    %c0_i32 = arith.constant 0 : i32
    %c0_i32_0 = arith.constant 0 : i32
    %c0_i32_1 = arith.constant 0 : i32
    return %c0_i32, %c0_i32_0 : i32, i32
  }
  func.func @transform_2(%arg0: i32) -> (i32, i32) {
    %c0_i32 = arith.constant 0 : i32
    %c0_i32_0 = arith.constant 0 : i32
    %c0_i32_1 = arith.constant 0 : i32
    return %c0_i32, %c0_i32_0 : i32, i32
  }
}

</mosaic_0001>

<bundles_post_ra>
// kernel: _lambda_.1
= control target key start
LH: loop header
LB: loop body
LE: loop exit
PB: predicated region body
PF: predicated region fallthrough
CT: control target
= control target key end

     0   :  { %v2221_v1 = vmov 2   ;;  %v2222_v2 = vmov 0   ;;  %s2574_s0 = inlined_call_operand.vmem [shape: f32[8,16], index: 0, kind: input, shape index: {}]   ;;  %s2575_s1 = inlined_call_operand.vmem [shape: f32[264,128], index: 1, kind: input, shape index: {}]   ;;  %s2576_s2 = inlined_call_operand.hbm [shape: f32[2,128], index: 2, kind: output, shape index: {}]  }
   0x1   :  { %v12_v0 = vld [vmem:[%s2574_s0] sm:$0xff]  ;;  %2148 = vset.pattern.permute.xlu1 %v2221_v1  ;;  %2146 = vset.pattern.permute.xlu0 %v2222_v2 }
   0x2   :  { %50 = vperm.xlu1 %2148, %v12_v0   ;;  %21 = vperm.xlu0 %2146, %v12_v0  }
   0x3   :  { %7 = vsyncpa [#allocation3], 0  ;;  %v2223_v3 = vmov 3   ;;  %v2224_v4 = vmov 1   ;;  %v2225_v5 = vmov 4   ;;  %v2226_v6 = vmov 5  }
   0x4   :  { %v2227_v7 = vmov 6   ;;  %v2228_v8 = vmov 8   ;;  %v2229_v9 = vmov 7   ;;  %v2230_v10 = vmov 11   ;;  %v216_v11 = vld [vmem:[%s2575_s1 + $0x10] sm:$0xff]  ;;  %v2268_v18 = vld [vmem:[%s2575_s1 + $0x8] sm:$0xff] }
   0x5   :  { %1892 = vmatprep.subr.mxu0 %v216_v11  ;;  %v2231_v12 = vmov 9   ;;  %v2232_v13 = vmov 14   ;;  %v2233_v14 = vmov 10   ;;  %v2234_v15 = vmov 15   ;;  %v13_v23 = vld [vmem:[%s2575_s1] sm:$0xf] }
   0x6   :  { %2149 = vset.pattern.permute.xlu1 %v2223_v3  ;;  %2147 = vset.pattern.permute.xlu0 %v2224_v4  ;;  %v2235_v16 = vmov 12   ;;  %v2236_v17 = vmov 13   ;;  %v2237_v19 = vmov 0.0   ;;  %v14_v20 = vlaneseq  ;;  %s2240_s17 = smov 96   ;;  %s2241_s18 = smov 64  }
   0x7   :  { %61 = vperm.xlu1 %2149, %v12_v0   ;;  %31 = vperm.xlu0 %2147, %v12_v0   ;;  %vm219_vm0 = vcmask 64512   ;;  %vm2238_vm1 = vmmov 0   ;;  %vm895_vm2 = vcmask 261120   ;;  %s2242_s19 = smov 32   ;;  %vm1150_vm4 = vcmask 1040384   ;;  %s2243_s21 = smov [#allocation2]  }
   0x8   :  { %1893 = vmatpush3.msra.mxu0 %v216_v11  ;;  %1934 = vmatprep.subr.mxu1 %v2237_v19  ;;  %v2273_v21 = vshrl.u32 %v14_v20, 7  ;;  %vm1683_vm5 = vcmask 130048   ;;  %s1764_s22 = sshll.u32 %s2243_s21, 4  ;;  %s1765_s22 = int_to_ptr.vmem [resolvable:$true] %s1764_s22 }
   0x9   :  { %1906 = vmatprep.subr.mxu0 %v2268_v18  ;;  %1936 = vmatprep.mubr.msk.f32.mxu1 %vm2238_vm1, %v2237_v19  ;;  %s2197_s23 = scalar_lea.vmem %s1765_s22, 32  ;;  %p2202_p1 = scmp.lt.s32.totalorder %s1765_s22, %s1765_s22 }
   0xa   :  { %v16_v22 = vsub.s32 0, %v2273_v21  ;;  %v26_v24 = vsub.s32 1, %v2273_v21  ;;  %v36_v27 = vsub.s32 2, %v2273_v21  ;;  %v42_v32 = vsub.s32 3, %v2273_v21  ;;  %p2198_p0 = scmp.ne.s32.totalorder %s1765_s22, %s2197_s23  ;;  %p2203_p2 = scmp.lt.s32.totalorder %s2197_s23, %s2197_s23 }
   0xb   :  { %2150 = vset.pattern.permute.xlu1 %v2225_v5  ;;  %2151 = vset.pattern.permute.xlu0 %v2226_v6 }
   0xc   :  { %72 = vperm.xlu1 %2150, %v12_v0   ;;  %83 = vperm.xlu0 %2151, %v12_v0   ;;  %v2280_v25 = vrot.slane %v13_v23, %v16_v22  ;;  %v2282_v26 = vrot.slane %v13_v23, %v26_v24  ;;  %v2288_v33 = vrot.slane %v13_v23, %v36_v27  ;;  %p2204_p3 = por %p2203_p2, %p2202_p1 }
   0xd   :  { %v2294_v41 = vrot.slane %v13_v23, %v42_v32 }
   0xe   :  { %v18_v29 = vmul.f32 0.0, %v2280_v25  ;;  %p2205_p4 = pnand %p2204_p3, %p2198_p0 }
  0x10   :  { %2152 = vset.pattern.permute.xlu1 %v2227_v7  ;;  %2154 = vset.pattern.permute.xlu0 %v2228_v8 }
  0x11   :  { %94 = vperm.xlu1 %2152, %v12_v0   ;;  %116 = vperm.xlu0 %2154, %v12_v0  }
  0x15   :  { %2153 = vset.pattern.permute.xlu1 %v2229_v9  ;;  %2157 = vset.pattern.permute.xlu0 %v2230_v10 }
  0x16   :  { %105 = vperm.xlu1 %2153, %v12_v0   ;;  %149 = vperm.xlu0 %2157, %v12_v0  }
  0x1a   :  { %2155 = vset.pattern.permute.xlu1 %v2231_v12  ;;  %2160 = vset.pattern.permute.xlu0 %v2232_v13 }
  0x1b   :  { %127 = vperm.xlu1 %2155, %v12_v0   ;;  %182 = vperm.xlu0 %2160, %v12_v0  }
  0x1f   :  { %2156 = vset.pattern.permute.xlu1 %v2233_v14  ;;  %2192 = vset.pattern.permute.xlu0 %v2234_v15 }
  0x20   :  { %138 = vperm.xlu1 %2156, %v12_v0  }
  0x24   :  { %2158 = vset.pattern.permute.xlu1 %v2235_v16 }
  0x25   :  { %160 = vperm.xlu1 %2158, %v12_v0  }
  0x29   :  { %2159 = vset.pattern.permute.xlu1 %v2236_v17 }
  0x2a   :  { %171 = vperm.xlu1 %2159, %v12_v0  }
  0x2e   :  { %2161 = vset.pattern.permute.xlu1 %v2234_v15 }
  0x2f   :  { %193 = vperm.xlu1 %2161, %v12_v0  }
  0x81   :  { %v51_v28 = vpop.permute.xlu1 %50  ;;  %v22_v30 = vpop.permute.xlu0 %21 }
  0x82   :  { %v28_v31 = vmul.f32 %v2282_v26, %v22_v30  ;;  %v46_v35 = vmul.f32 %v22_v30, %v2280_v25  ;;  %v58_v40 = vmul.f32 %v51_v28, %v2282_v26  ;;  %v68_v44 = vmul.f32 %v51_v28, %v2280_v25 }
  0x83   :  { %v53_v49 = vmul.f32 %v51_v28, %v2288_v33 }
  0x84   :  { %v29_v34 = vadd.f32 %v28_v31, %v18_v29  ;;  %v2329_v31 = vld [vmem:[%s2575_s1 + $0x18] sm:$0xff] }
  0x86   :  { %v62_v36 = vpop.permute.xlu1 %61  ;;  %v32_v37 = vpop.permute.xlu0 %31 }
  0x87   :  { %v69_v38 = vmul.f32 %v62_v36, %v2282_v26  ;;  %v38_v39 = vmul.f32 %v2288_v33, %v32_v37  ;;  %v47_v42 = vmul.f32 %v32_v37, %v2282_v26  ;;  %v57_v43 = vmul.f32 %v32_v37, %v2280_v25 }
  0x88   :  { %v64_v46 = vmul.f32 %v62_v36, %v2288_v33  ;;  %v79_v51 = vmul.f32 %v62_v36, %v2280_v25 }
  0x89   :  { %v39_v45 = vadd.f32 %v38_v39, %v29_v34  ;;  %v48_v47 = vadd.f32 %v47_v42, %v46_v35  ;;  %v59_v48 = vadd.f32 %v58_v40, %v57_v43  ;;  %v70_v50 = vadd.f32 %v69_v38, %v68_v44 }
  0x8b   :  { %v73_v52 = vpop.permute.xlu1 %72  ;;  %v84_v53 = vpop.permute.xlu0 %83  ;;  %v65_v54 = vadd.f32 %v64_v46, %v59_v48  ;;  %v44_v57 = vadd.f32 %v2294_v41, %v39_v45  ;;  %v54_v0 = vadd.f32 %v53_v49, %v48_v47 }
  0x8c   :  { %v75_v55 = vmul.f32 %v73_v52, %v2288_v33  ;;  %v80_v56 = vmul.f32 %v73_v52, %v2282_v26  ;;  %v90_v58 = vmul.f32 %v73_v52, %v2280_v25  ;;  %v86_v59 = vmul.f32 %v84_v53, %v2288_v33 }
  0x8d   :  { %v91_v60 = vmul.f32 %v84_v53, %v2282_v26  ;;  %v66_v61 = vadd.f32 %v65_v54, %v2294_v41  ;;  %v45_v4 = vmax.f32 %v44_v57, 0.0  ;;  %v55_v5 = vadd.f32 %v54_v0, %v2294_v41 }
  0x8e   :  { %v76_v62 = vadd.f32 %v75_v55, %v70_v50  ;;  %v81_v63 = vadd.f32 %v80_v56, %v79_v51  ;;  %v101_v7 = vmul.f32 %v84_v53, %v2280_v25 }
  0x8f   :  { %v92_v6 = vadd.f32 %v91_v60, %v90_v58  ;;  %v56_v11 = vmax.f32 %v55_v5, 0.0  ;;  %v67_v12 = vmax.f32 %v66_v61, 0.0 }
  0x90   :  { %v77_v1 = vadd.f32 %v76_v62, %v2294_v41  ;;  %v87_v2 = vadd.f32 %v86_v59, %v81_v63  ;;  %v95_v3 = vpop.permute.xlu1 %94  ;;  %v117_v24 = vpop.permute.xlu0 %116 }
  0x91   :  { %v97_v8 = vmul.f32 %v95_v3, %v2288_v33  ;;  %v102_v10 = vmul.f32 %v95_v3, %v2282_v26  ;;  %v2315_v15 = vmax.f32 %v45_v4, %v56_v11  ;;  %v112_v22 = vmul.f32 %v95_v3, %v2280_v25 }
  0x92   :  { %v78_v9 = vmax.f32 %v77_v1, 0.0  ;;  %v88_v13 = vadd.f32 %v87_v2, %v2294_v41  ;;  %v119_v30 = vmul.f32 %v117_v24, %v2288_v33  ;;  %v124_v38 = vmul.f32 %v117_v24, %v2282_v26 }
  0x93   :  { %v98_v14 = vadd.f32 %v97_v8, %v92_v6  ;;  %v103_v27 = vadd.f32 %v102_v10, %v101_v7  ;;  %1894 = vmatprep.mubr.msk.f32.mxu0 %vm219_vm0, %v2315_v15  ;;  %v134_v47 = vmul.f32 %v117_v24, %v2280_v25 }
  0x94   :  { %v2317_v16 = vmax.f32 %v67_v12, %v78_v9  ;;  %v89_v32 = vmax.f32 %v88_v13, 0.0 }
  0x95   :  { %v99_v17 = vadd.f32 %v98_v14, %v2294_v41  ;;  %v106_v23 = vpop.permute.xlu1 %105  ;;  %v150_v51 = vpop.permute.xlu0 %149 }
  0x96   :  { %v108_v28 = vmul.f32 %v106_v23, %v2288_v33  ;;  %v113_v29 = vmul.f32 %v106_v23, %v2282_v26  ;;  %1895 = vmatmul.mubr.msk.f32.vlgmr.msra.gmra.mrb[0].mxu0 %vm219_vm0, %v2317_v16  ;;  %v123_v37 = vmul.f32 %v106_v23, %v2280_v25  ;;  %v152_v54 = vmul.f32 %v150_v51, %v2288_v33 }
  0x97   :  { %v100_v34 = vmax.f32 %v99_v17, 0.0  ;;  %1907 = vmatpush3.msra.mxu0 %v2268_v18  ;;  %v157_v60 = vmul.f32 %v150_v51, %v2282_v26  ;;  %v167_v7 = vmul.f32 %v150_v51, %v2280_v25 }
  0x98   :  { %v109_v35 = vadd.f32 %v108_v28, %v103_v27  ;;  %v114_v36 = vadd.f32 %v113_v29, %v112_v22  ;;  %1920 = vmatprep.subr.mxu0 %v2329_v31  ;;  %v125_v46 = vadd.f32 %v124_v38, %v123_v37 }
  0x99   :  { %v2336_v39 = vmax.f32 %v89_v32, %v100_v34 }
  0x9a   :  { %v110_v40 = vadd.f32 %v109_v35, %v2294_v41  ;;  %v120_v42 = vadd.f32 %v119_v30, %v114_v36  ;;  %v128_v43 = vpop.permute.xlu1 %127  ;;  %v183_v11 = vpop.permute.xlu0 %182 }
  0x9b   :  { %v130_v44 = vmul.f32 %v128_v43, %v2288_v33  ;;  %1897 = vmatprep.mubr.msk.f32.mxu0 %vm219_vm0, %v2336_v39  ;;  %v135_v18 = vmul.f32 %v128_v43, %v2282_v26  ;;  %v145_v52 = vmul.f32 %v128_v43, %v2280_v25  ;;  %v185_v17 = vmul.f32 %v183_v11, %v2288_v33 }
  0x9c   :  { %v121_v45 = vadd.f32 %v120_v42, %v2294_v41  ;;  %v111_v48 = vmax.f32 %v110_v40, 0.0  ;;  %v190_v32 = vmul.f32 %v183_v11, %v2282_v26  ;;  %v200_v36 = vmul.f32 %v183_v11, %v2280_v25 }
  0x9d   :  { %v131_v50 = vadd.f32 %v130_v44, %v125_v46  ;;  %v136_v55 = vadd.f32 %v135_v18, %v134_v47  ;;  %v203_v44 = vmul.f32 0.0, %v2288_v33 }
  0x9e   :  { %v122_v49 = vmax.f32 %v121_v45, 0.0 }
  0x9f   :  { %v139_v53 = vpop.permute.xlu1 %138  ;;  %v132_v61 = vadd.f32 %v131_v50, %v2294_v41 }
  0xa0   :  { %v141_v56 = vmul.f32 %v139_v53, %v2288_v33  ;;  %v146_v57 = vmul.f32 %v139_v53, %v2282_v26  ;;  %v2350_v58 = vmax.f32 %v111_v48, %v122_v49  ;;  %v156_v59 = vmul.f32 %v139_v53, %v2280_v25 }
  0xa1   :  { %v133_v5 = vmax.f32 %v132_v61, 0.0 }
  0xa2   :  { %v142_v62 = vadd.f32 %v141_v56, %v136_v55  ;;  %v147_v63 = vadd.f32 %v146_v57, %v145_v52  ;;  %1898 = vmatmul.mubr.msk.f32.gmra.mrb[2].mxu0 %vm219_vm0, %v2350_v58  ;;  %v158_v3 = vadd.f32 %v157_v60, %v156_v59 }
  0xa4   :  { %v143_v0 = vadd.f32 %v142_v62, %v2294_v41  ;;  %v153_v1 = vadd.f32 %v152_v54, %v147_v63  ;;  %v161_v2 = vpop.permute.xlu1 %160  ;;  %v670_v63 = vld [vmem:[%s2575_s1 + $0x38] sm:$0xff] }
  0xa5   :  { %v163_v4 = vmul.f32 %v161_v2, %v2288_v33  ;;  %v168_v8 = vmul.f32 %v161_v2, %v2282_v26  ;;  %v178_v23 = vmul.f32 %v161_v2, %v2280_v25 }
  0xa6   :  { %v144_v6 = vmax.f32 %v143_v0, 0.0  ;;  %v154_v9 = vadd.f32 %v153_v1, %v2294_v41 }
  0xa7   :  { %v164_v10 = vadd.f32 %v163_v4, %v158_v3  ;;  %v169_v22 = vadd.f32 %v168_v8, %v167_v7 }
  0xa8   :  { %v211_v12 = vmax.f32 %v133_v5, %v144_v6  ;;  %v155_v28 = vmax.f32 %v154_v9, 0.0 }
  0xa9   :  { %v165_v13 = vadd.f32 %v164_v10, %v2294_v41  ;;  %v172_v14 = vpop.permute.xlu1 %171 }
  0xaa   :  { %v174_v24 = vmul.f32 %v172_v14, %v2288_v33  ;;  %v179_v27 = vmul.f32 %v172_v14, %v2282_v26  ;;  %1900 = vmatprep.mubr.msk.f32.mxu0 %vm219_vm0, %v211_v12  ;;  %v189_v30 = vmul.f32 %v172_v14, %v2280_v25  ;;  %v745_v14 = vld [vmem:[%s2575_s1 + $0x40] sm:$0xff] }
  0xab   :  { %v166_v29 = vmax.f32 %v165_v13, 0.0 }
  0xac   :  { %v175_v34 = vadd.f32 %v174_v24, %v169_v22  ;;  %v180_v35 = vadd.f32 %v179_v27, %v178_v23  ;;  %v191_v43 = vadd.f32 %v190_v32, %v189_v30  ;;  %v820_v24 = vld [vmem:[%s2575_s1 + $0x48] sm:$0xff]  ;;  %v974_v32 = vand.u32 127, %v14_v20 }
  0xad   :  { %v212_v37 = vmax.f32 %v155_v28, %v166_v29  ;;  %v594_v27 = vld [vmem:[%s2575_s1 + $0x28] sm:$0xff]  ;;  %v2239_v20 = vmov 0.0|0.0  }
  0xae   :  { %v176_v38 = vadd.f32 %v175_v34, %v2294_v41  ;;  %v186_v40 = vadd.f32 %v185_v17, %v180_v35  ;;  %v194_v42 = vpop.permute.xlu1 %193  ;;  %v975_v34 = vand.u32 4294967292, %v2273_v21  ;;  %v976_v35 = vand.u32 4294967292, %v974_v32 }
  0xaf   :  { %v196_v45 = vmul.f32 %v194_v42, %v2288_v33  ;;  %v201_v46 = vmul.f32 %v194_v42, %v2282_v26  ;;  %1901 = vmatmul.mubr.msk.f32.gmra.mrb[4].mxu0 %vm219_vm0, %v212_v37  ;;  %v595_v26 = vld [vmem:[%s2575_s1 + $0x30] sm:$0xff] }
  0xb0   :  { %v187_v47 = vadd.f32 %v186_v40, %v2294_v41  ;;  %v177_v49 = vmax.f32 %v176_v38, 0.0  ;;  %1935 = vmatpush3.msra.mxu1 %v595_v26  ;;  %vm977_vm3 = vcmp.eq.s32.totalorder %v975_v34, %v976_v35  ;;  %v1154_v26 = vld [vmem:[%s2575_s1 + $0x88] sm:$0xff] }
  0xb1   :  { %v197_v18 = vadd.f32 %v196_v45, %v191_v43  ;;  %v202_v48 = vadd.f32 %v201_v46, %v200_v36  ;;  %1939 = vmatprep.subr.mxu1 %v2237_v19 }
  0xb2   :  { %v188_v25 = vmax.f32 %v187_v47, 0.0 }
  0xb3   :  { %v198_v50 = vadd.f32 %v197_v18, %v2294_v41  ;;  %v204_v51 = vadd.f32 %v203_v44, %v202_v48  ;;  %v1063_v48 = vld [vmem:[%s2575_s1 + $0x50] sm:$0xff] }
  0xb4   :  { %v213_v52 = vmax.f32 %v177_v49, %v188_v25  ;;  %v1064_v49 = vld [vmem:[%s2575_s1 + $0x58] sm:$0xff] }
  0xb5   :  { %v205_v53 = vadd.f32 %v204_v51, %v2294_v41  ;;  %v199_v54 = vmax.f32 %v198_v50, 0.0  ;;  %v1794_v41 = vld [vmem:[%s2575_s1 + $0x20] ss:$0 sm:$0xff]  ;;  %v2049_v50 = vpack.c.bf16 %v1064_v49, %v1063_v48  ;;  %v1805_v49 = vld [vmem:[%s2575_s1 + $0x98] ss:$0 sm:$0xff] }
  0xb6   :  { %1903 = vmatprep.mubr.msk.f32.mxu0 %vm219_vm0, %v213_v52 }
  0xb7   :  { %v206_v33 = vmax.f32 %v205_v53, 0.0  ;;  %v1066_v53 = vld [vmem:[%s2575_s1 + $0x68] sm:$0xff] }
  0xb9   :  { %v214_v55 = vmax.f32 %v199_v54, %v206_v33  ;;  %v1152_v33 = vld [vmem:[%s2575_s1 + $0x78] sm:$0xff] }
  0xbb   :  { %1904 = vmatmul.mubr.msk.f32.gmra.mrb[6].mxu0 %vm219_vm0, %v214_v55 }
  0xbc   :  { %1908 = vmatprep.mubr.f32.mxu0 %v2237_v19 }
  0xbf   :  { %1909 = vmatmul.mubr.msk.f32.vlgmr.msra.gmra.mrb[0].mxu0 %vm219_vm0, %v2315_v15 }
  0xc0   :  { %1911 = vmatprep.mubr.msk.f32.mxu0 %vm219_vm0, %v2317_v16  ;;  %1921 = vmatpush3.msra.mxu0 %v2329_v31 }
  0xc1   :  { %2078 = vmatprep.subr.bf16.mxu0 %v2239_v20 }
  0xc3   :  { %1912 = vmatmul.mubr.msk.f32.gmra.mrb[2].mxu0 %vm219_vm0, %v2336_v39 }
  0xc4   :  { %1914 = vmatprep.mubr.msk.f32.mxu0 %vm219_vm0, %v2350_v58 }
  0xc7   :  { %1915 = vmatmul.mubr.msk.f32.gmra.mrb[4].mxu0 %vm219_vm0, %v211_v12 }
  0xc8   :  { %1917 = vmatprep.mubr.msk.f32.mxu0 %vm219_vm0, %v212_v37 }
  0xcb   :  { %1918 = vmatmul.mubr.msk.f32.gmra.mrb[6].mxu0 %vm219_vm0, %v213_v52 }
  0xcc   :  { %1922 = vmatprep.mubr.msk.f32.mxu0 %vm219_vm0, %v2317_v16 }
  0xcf   :  { %1923 = vmatmul.mubr.msk.f32.vlgmr.msra.gmra.mrb[0].mxu0 %vm219_vm0, %v2336_v39 }
  0xd0   :  { %1925 = vmatprep.mubr.msk.f32.mxu0 %vm219_vm0, %v2350_v58 }
  0xd3   :  { %1926 = vmatmul.mubr.msk.f32.gmra.mrb[2].mxu0 %vm219_vm0, %v211_v12 }
  0xd4   :  { %1928 = vmatprep.mubr.msk.f32.mxu0 %vm219_vm0, %v212_v37 }
  0xd7   :  { %1929 = vmatmul.mubr.msk.f32.gmra.mrb[4].mxu0 %vm219_vm0, %v213_v52  ;;  %v1065_v52 = vld [vmem:[%s2575_s1 + $0x60] sm:$0xff] }
  0xd8   :  { %1931 = vmatprep.mubr.msk.f32.mxu0 %vm219_vm0, %v214_v55  ;;  %v2052_v54 = vpack.c.bf16 %v1066_v53, %v1065_v52  ;;  %v1153_v55 = vld [vmem:[%s2575_s1 + $0x80] sm:$0xff] }
  0xdb   :  { %1932 = vmatmul.mubr.f32.gmra.mrb[6].mxu0 %v2237_v19 }
  0xdc   :  { %2027 = vmatprep.mubr.msk.f32.mxu0 %vm2238_vm1, %v2237_v19 }
 0x1a2   :  { %v1924_v15 = vpop.f32.mrb[0].mxu0 }
 0x1a3   :  { %v575_v16 = vadd.f32 %v1924_v15, %v1794_v41  ;;  %v523_v31 = vpop.f32.mrb[1].mxu0  ;;  %v1155_v15 = vld [vmem:[%s2575_s1 + $0x90] sm:$0xff] }
 0x1a4   :  { %v574_v39 = vadd.f32 %v1794_v41, %v523_v31 }
 0x1a5   :  { %v583_v56 = vmax.f32 %v575_v16, 0.0  ;;  %v2167_v16 = vpack.i.bf16 %v1155_v15, %v1154_v26 }
 0x1a6   :  { %v582_v57 = vmax.f32 %v574_v39, 0.0  ;;  %v1927_v58 = vpop.f32.mrb[2].mxu0 }
 0x1a7   :  { %v577_v59 = vadd.f32 %v1927_v58, %v1794_v41  ;;  %v533_v60 = vpop.f32.mrb[3].mxu0  ;;  %v1510_v58 = vld [vmem:[%s2575_s1 + $0xa0] sm:$0xff] }
 0x1a8   :  { %v590_v61 = vmax.f32 %v582_v57, %v583_v56  ;;  %v576_v62 = vadd.f32 %v1794_v41, %v533_v60  ;;  %v2055_v56 = vpack.c.bf16 %v1153_v55, %v1152_v33  ;;  %v2058_v57 = vpack.c.bf16 %v1155_v15, %v1154_v26  ;;  %v1512_v60 = vld [vmem:[%s2575_s1 + $0xb0] sm:$0xff]  ;;  %v1596_v26 = vld [vmem:[%s2575_s1 + $0xe0] sm:$0xff] }
 0x1a9   :  { %v585_v0 = vmax.f32 %v577_v59, 0.0  ;;  %v1511_v59 = vld [vmem:[%s2575_s1 + $0xa8] sm:$0xff]  ;;  %v1809_v15 = vld [vmem:[%s2575_s1 + $0xc0] ss:$0 sm:$0xff] }
 0x1aa   :  { %v584_v1 = vmax.f32 %v576_v62, 0.0  ;;  %v1930_v2 = vpop.f32.mrb[4].mxu0  ;;  %1937 = vmatmul.mubr.msk.f32.vlgmr.msra.gmra.mrb[0].mxu1 %vm219_vm0, %v590_v61  ;;  %v2079_v61 = vpack.c.bf16 %v1511_v59, %v1510_v58  ;;  %v1513_v62 = vld [vmem:[%s2575_s1 + $0xb8] sm:$0xff]  ;;  %v1811_v59 = vld [vmem:[%s2575_s1 + $0xe8] ss:$0 sm:$0xff] }
 0x1ab   :  { %v579_v3 = vadd.f32 %v1930_v2, %v1794_v41  ;;  %v543_v4 = vpop.f32.mrb[5].mxu0  ;;  %1940 = vmatpush3.msra.mxu1 %v670_v63  ;;  %1941 = vmatprep.mubr.msk.f32.mxu1 %vm2238_vm1, %v2237_v19  ;;  %v2082_v63 = vpack.c.bf16 %v1513_v62, %v1512_v60 }
 0x1ac   :  { %v591_v5 = vmax.f32 %v584_v1, %v585_v0  ;;  %v578_v6 = vadd.f32 %v1794_v41, %v543_v4  ;;  %1944 = vmatprep.subr.mxu1 %v2237_v19  ;;  %2080 = vmatpush3.bf16.msra.mxu0 %v2079_v61  ;;  %v1802_v0 = vld [vmem:[%s2575_s1 + $0x70] ss:$0 sm:$0xff] }
 0x1ad   :  { %v587_v7 = vmax.f32 %v579_v3, 0.0  ;;  %2081 = vmatprep.subr.bf16.mxu0 %v2239_v20 }
 0x1ae   :  { %v586_v8 = vmax.f32 %v578_v6, 0.0  ;;  %v1933_v9 = vpop.f32.mrb[6].mxu0 }
 0x1af   :  { %v581_v10 = vadd.f32 %v1933_v9, %v1794_v41  ;;  %v553_v11 = vpop.f32.mrb[7].mxu0 }
 0x1b0   :  { %v592_v12 = vmax.f32 %v586_v8, %v587_v7  ;;  %v580_v13 = vadd.f32 %v1794_v41, %v553_v11  ;;  %v2162_v41 = vpack.i.bf16 %v1153_v55, %v1152_v33  ;;  %2083 = vmatpush3.bf16.msra.mxu0 %v2082_v63  ;;  %v1595_v55 = vld [vmem:[%s2575_s1 + $0xd8] sm:$0xff] }
 0x1b1   :  { %v589_v17 = vmax.f32 %v581_v10, 0.0  ;;  %2084 = vmatprep.subr.bf16.mxu0 %v2239_v20 }
 0x1b2   :  { %v588_v22 = vmax.f32 %v580_v13, 0.0  ;;  %1942 = vmatmul.mubr.msk.f32.vlgmr.msra.gmra.mrb[0].mxu1 %vm219_vm0, %v591_v5 }
 0x1b3   :  { %1945 = vmatpush3.msra.mxu1 %v745_v14  ;;  %1946 = vmatprep.mubr.msk.f32.mxu1 %vm2238_vm1, %v2237_v19 }
 0x1b4   :  { %v593_v23 = vmax.f32 %v588_v22, %v589_v17  ;;  %1949 = vmatprep.subr.mxu1 %v2237_v19 }
 0x1ba   :  { %1947 = vmatmul.mubr.msk.f32.vlgmr.msra.gmra.mrb[0].mxu1 %vm219_vm0, %v592_v12 }
 0x1bb   :  { %1950 = vmatpush3.msra.mxu1 %v820_v24  ;;  %1951 = vmatprep.mubr.msk.f32.mxu1 %vm2238_vm1, %v2237_v19 }
 0x1bc   :  { %1954 = vmatprep.subr.mxu1 %v2237_v19 }
 0x1c2   :  { %1952 = vmatmul.mubr.msk.f32.vlgmr.msra.gmra.mrb[0].mxu1 %vm219_vm0, %v593_v23 }
 0x1c3   :  { %1956 = vmatprep.mubr.msk.f32.mxu1 %vm2238_vm1, %v2237_v19 }
 0x295   :  { %v890_v28 = vpop.f32.mrb[0].mxu1 }
 0x296   :  { %v2093_v29 = vadd.f32 %v890_v28, %v594_v27  ;;  %v1953_v30 = vpop.f32.mrb[1].mxu1 }
 0x298   :  { %1955 = vmatpush3.xpose.msk.msra.mxu1 %vm895_vm2, %v2093_v29 }
 0x299   :  { %1959 = vmatprep.subr.mxu1 %v2237_v19 }
 0x29b   :  { %1957 = vmatmul.mubr.msk.f32.vlgmr.msra.gmra.mrb[2].mxu1 %vm895_vm2, %v2093_v29 }
 0x29c   :  { %1960 = vmatpush3.msra.mxu1 %v2093_v29  ;;  %1961 = vmatprep.mubr.msk.f32.mxu1 %vm2238_vm1, %v2237_v19 }
 0x29d   :  { %2048 = vmatprep.subr.bf16.mxu1 %v2239_v20 }
 0x36e   :  { %v965_v36 = vpop.f32.mrb[2].mxu1 }
 0x36f   :  { %v969_v37 = vmax.f32 %v965_v36, 0.0  ;;  %v1958_v38 = vpop.f32.mrb[3].mxu1 }
 0x371   :  { %v970_v40 = vmul.f32 0.7, %v969_v37 }
 0x373   :  { %v978_v42 = vsel %vm977_vm3, %v970_v40, -1e+30 }
 0x374   :  { %v979_v43 = vsel %vm219_vm0, %v978_v42, -inf }
 0x375   :  { %980 = vmax.xlane.f32.xlu1 %v979_v43 }
 0x386   :  { %2168 = vrot.lane.b32.xlu1 %v2167_v16, %s2240_s17 }
 0x38a   :  { %2173 = vrot.lane.b32.xlu1 %v2162_v41, %s2241_s18 }
 0x38e   :  { %2183 = vrot.lane.b32.xlu1 %v2162_v41, %s2242_s19 }
 0x402   :  { %v981_v44 = vpop.xlane.xlu1 %980 }
 0x403   :  { %v982_v45 = vsub.f32 %v978_v42, %v981_v44 }
 0x405   :  { %v983_v46 = vmul.f32 1.442695, %v982_v45 }
 0x406   :  { %v2169_v3 = vpop.permute.xlu1 %2168 }
 0x407   :  { %2193 = vpow2.f32 %v983_v46  ;;  %v2171_v10 = vunpack.i.h.bf16 %v2169_v3  ;;  %v2170_v11 = vunpack.i.l.bf16 %v2169_v3 }
 0x409   :  { %v2064_v17 = vpack.c.bf16 %v2171_v10, %v2170_v11 }
 0x40a   :  { %v2174_v13 = vpop.permute.xlu1 %2173 }
 0x40b   :  { %v2176_v22 = vunpack.i.h.bf16 %v2174_v13  ;;  %v2175_v23 = vunpack.i.l.bf16 %v2174_v13 }
 0x40d   :  { %v2067_v29 = vpack.c.bf16 %v2176_v22, %v2175_v23 }
 0x40e   :  { %v2184_v34 = vpop.permute.xlu1 %2183 }
 0x40f   :  { %v2186_v37 = vunpack.i.h.bf16 %v2184_v34  ;;  %v2185_v38 = vunpack.i.l.bf16 %v2184_v34 }
 0x411   :  { %v2194_v47 = vpop.eup %2193  ;;  %v2073_v44 = vpack.c.bf16 %v2186_v37, %v2185_v38 }
 0x412   :  { %v985_v18 = vsel %vm219_vm0, %v2194_v47, 0.0 }
 0x413   :  { %986 = vadd.xlane.f32.xlu0 %v985_v18 }
 0x429   :  { %2163 = vrot.lane.b32.xlu0 %v2162_v41, %s2240_s17  ;;  %v2088_v41 = vpack.c.bf16 %v1596_v26, %v1595_v55 }
 0x42d   :  { %2178 = vrot.lane.b32.xlu0 %v2167_v16, %s2241_s18 }
 0x431   :  { %2188 = vrot.lane.b32.xlu0 %v2167_v16, %s2242_s19 }
 0x4a0   :  { %v987_v21 = vpop.xlane.xlu0 %986 }
 0x4a1   :  { %2195 = vrcp.f32 %v987_v21 }
 0x4a4   :  { %v2164_v1 = vpop.permute.xlu0 %2163 }
 0x4a5   :  { %v2166_v6 = vunpack.i.h.bf16 %v2164_v1  ;;  %v2165_v7 = vunpack.i.l.bf16 %v2164_v1 }
 0x4a7   :  { %v2061_v9 = vpack.c.bf16 %v2166_v6, %v2165_v7 }
 0x4a8   :  { %v2179_v24 = vpop.permute.xlu0 %2178 }
 0x4a9   :  { %v2181_v30 = vunpack.i.h.bf16 %v2179_v24  ;;  %v2180_v32 = vunpack.i.l.bf16 %v2179_v24 }
 0x4ab   :  { %v2196_v25 = vpop.eup %2195  ;;  %v2070_v36 = vpack.c.bf16 %v2181_v30, %v2180_v32 }
 0x4ac   :  { %v989_v51 = vmul.f32 %v2196_v25, %v2194_v47  ;;  %v2189_v40 = vpop.permute.xlu0 %2188  ;;  %v1593_v25 = vld [vmem:[%s2575_s1 + $0xc8] sm:$0xff] }
 0x4ad   :  { %v2191_v45 = vunpack.i.h.bf16 %v2189_v40  ;;  %v2190_v46 = vunpack.i.l.bf16 %v2189_v40 }
 0x4ae   :  { %1962 = vmatmul.mubr.msk.f32.vlgmr.msra.gmra.mrb[4].mxu1 %vm219_vm0, %v989_v51 }
 0x4af   :  { %2050 = vmatpush3.bf16.msra.mxu1 %v2049_v50  ;;  %1972 = vmatprep.mubr.msk.f32.mxu1 %vm2238_vm1, %v2237_v19  ;;  %v2076_v18 = vpack.c.bf16 %v2191_v45, %v2190_v46  ;;  %v1594_v50 = vld [vmem:[%s2575_s1 + $0xd0] sm:$0xff] }
 0x4b0   :  { %2051 = vmatprep.subr.bf16.mxu1 %v2239_v20 }
 0x4b3   :  { %2053 = vmatpush3.bf16.msra.mxu1 %v2052_v54  ;;  %v2085_v54 = vpack.c.bf16 %v1594_v50, %v1593_v25 }
 0x4b4   :  { %2054 = vmatprep.subr.bf16.mxu1 %v2239_v20 }
 0x581   :  { %v1059_v31 = vpop.f32.mrb[4].mxu1 }
 0x582   :  { %v1963_v39 = vpop.f32.mrb[5].mxu1  ;;  %1973 = vmatmul.mubr.msk.f32.vlgmr.msra.gmra.mrb[6].mxu1 %vm895_vm2, %v1059_v31 }
 0x583   :  { %1983 = vmatprep.mubr.msk.f32.mxu1 %vm2238_vm1, %v2237_v19  ;;  %2056 = vmatpush3.bf16.msra.mxu1 %v2055_v56 }
 0x584   :  { %2057 = vmatprep.subr.bf16.mxu1 %v2239_v20 }
 0x587   :  { %2059 = vmatpush3.bf16.msra.mxu1 %v2058_v57  ;;  %v1676_v57 = vld [vmem:[%s2575_s1 + $0xf0] sm:$0xff] }
 0x588   :  { %2060 = vmatprep.subr.bf16.mxu1 %v2239_v20 }
 0x655   :  { %v1141_v2 = vpop.f32.mrb[6].mxu1 }
 0x656   :  { %v1142_v4 = vadd.f32 %v1802_v0, %v1141_v2  ;;  %v1974_v5 = vpop.f32.mrb[7].mxu1 }
 0x658   :  { %v1145_v8 = vmax.f32 %v1142_v4, 0.0 }
 0x65a   :  { %v1148_v12 = vrot.slane %v1145_v8, 3  ;;  %v1234_v27 = vrot.slane %v1145_v8, 1  ;;  %v1236_v28 = vrot.slane %v1145_v8, 4  ;;  %v1329_v42 = vrot.slane %v1145_v8, 2 }
 0x65b   :  { %v1331_v43 = vrot.slane %v1145_v8, 5  ;;  %v1420_v21 = vrot.slane %v1145_v8, 6 }
 0x65c   :  { %v1151_v14 = vsel %vm1150_vm4, %v1145_v8, %v1148_v12  ;;  %v1238_v35 = vsel %vm1150_vm4, %v1234_v27, %v1236_v28 }
 0x65d   :  { %1984 = vmatmul.mubr.msk.f32.vlgmr.msra.gmra.mrb[8].mxu1 %vm895_vm2, %v1151_v14  ;;  %v1333_v47 = vsel %vm1150_vm4, %v1329_v42, %v1331_v43  ;;  %v1422_v48 = vsel %vm1150_vm4, %v1148_v12, %v1420_v21 }
 0x65e   :  { %2062 = vmatpush3.bf16.msra.mxu1 %v2061_v9  ;;  %1994 = vmatprep.mubr.msk.f32.mxu1 %vm2238_vm1, %v2237_v19 }
 0x65f   :  { %2063 = vmatprep.subr.bf16.mxu1 %v2239_v20 }
 0x662   :  { %2065 = vmatpush3.bf16.msra.mxu1 %v2064_v17 }
 0x663   :  { %2066 = vmatprep.subr.bf16.mxu1 %v2239_v20 }
 0x665   :  { %1995 = vmatmul.mubr.msk.f32.vlgmr.msra.gmra.mrb[8].mxu1 %vm895_vm2, %v1238_v35 }
 0x666   :  { %2068 = vmatpush3.bf16.msra.mxu1 %v2067_v29  ;;  %2005 = vmatprep.mubr.msk.f32.mxu1 %vm2238_vm1, %v2237_v19 }
 0x667   :  { %2069 = vmatprep.subr.bf16.mxu1 %v2239_v20 }
 0x66a   :  { %2071 = vmatpush3.bf16.msra.mxu1 %v2070_v36 }
 0x66b   :  { %2072 = vmatprep.subr.bf16.mxu1 %v2239_v20 }
 0x66d   :  { %2006 = vmatmul.mubr.msk.f32.vlgmr.msra.gmra.mrb[8].mxu1 %vm895_vm2, %v1333_v47 }
 0x66e   :  { %2074 = vmatpush3.bf16.msra.mxu1 %v2073_v44  ;;  %2016 = vmatprep.mubr.msk.f32.mxu1 %vm2238_vm1, %v2237_v19 }
 0x66f   :  { %2075 = vmatprep.subr.bf16.mxu1 %v2239_v20 }
 0x672   :  { %2077 = vmatpush3.bf16.msra.mxu1 %v2076_v18 }
 0x675   :  { %2017 = vmatmul.mubr.msk.f32.vlgmr.msra.gmra.mrb[8].mxu1 %vm895_vm2, %v1422_v48 }
 0x748   :  { %v1504_v51 = vpop.f32.mrb[8].mxu1 }
 0x749   :  { %v2094_v52 = vadd.f32 %v1805_v49, %v1504_v51  ;;  %v2018_v53 = vpop.f32.mrb[9].mxu1 }
 0x74b   :  { %v1509_v33 = vmax.f32 %v2094_v52, 0.0 }
 0x74d   :  { %2028 = vmatmul.mubr.msk.f32.vlgmr.msra.gmra.mrb[8].mxu0 %vm895_vm2, %v1509_v33 }
 0x74e   :  { %2086 = vmatpush3.bf16.msra.mxu0 %v2085_v54  ;;  %2038 = vmatprep.mubr.msk.f32.mxu0 %vm2238_vm1, %v2237_v19 }
 0x74f   :  { %2087 = vmatprep.subr.bf16.mxu0 %v2239_v20 }
 0x752   :  { %2089 = vmatpush3.bf16.msra.mxu0 %v2088_v41 }
 0x753   :  { %2090 = vmatprep.subr.bf16.mxu0 %v2239_v20  ;;  %v1677_v20 = vld [vmem:[%s2575_s1 + $0xf8] sm:$0xff] }
 0x754   :  { %v2091_v58 = vpack.c.bf16 %v1677_v20, %v1676_v57 }
 0x820   :  { %v1588_v16 = vpop.f32.mrb[8].mxu0 }
 0x821   :  { %v1589_v31 = vadd.f32 %v1809_v15, %v1588_v16  ;;  %v2029_v39 = vpop.f32.mrb[9].mxu0 }
 0x823   :  { %v1592_v56 = vmax.f32 %v1589_v31, 0.0 }
 0x825   :  { %2039 = vmatmul.mubr.msk.f32.vlgmr.msra.gmra.mrb[10].mxu0 %vm895_vm2, %v1592_v56 }
 0x826   :  { %2045 = vmatprep.mubr.msk.f32.mxu0 %vm2238_vm1, %v2237_v19  ;;  %2092 = vmatpush3.bf16.msra.mxu0 %v2091_v58  ;;  %v1813_v19 = vld [vmem:[%s2575_s1 + $0x100] ss:$0 sm:$0xff] }
 0x8f8   :  { %v1671_v60 = vpop.f32.mrb[10].mxu0 }
 0x8f9   :  { %v1672_v61 = vadd.f32 %v1811_v59, %v1671_v60  ;;  %v2040_v62 = vpop.f32.mrb[11].mxu0 }
 0x8fb   :  { %v1675_v63 = vmax.f32 %v1672_v61, 0.0 }
 0x8fd   :  { %2046 = vmatmul.mubr.msk.f32.vlgmr.msra.gmra.mrb[12].mxu0 %vm1683_vm5, %v1675_v63 }
 0x9d0   :  { %v1753_v0 = vpop.f32.mrb[12].mxu0 }
 0x9d1   :  { %v1754_v1 = vadd.f32 %v1813_v19, %v1753_v0  ;;  %v2047_v2 = vpop.f32.mrb[13].mxu0 }
 0x9d3   :  { %1757 = vst [vmem:[#allocation2] sm:$0x3] %v1754_v1 }
 0x9d4   :  { %2208 = shalt.err (!%p2205_p4)
}
 0x9d5   :  { %s2209_s26 = scalar_lea.hbm %s2576_s2, 32 }
 0x9d6   :  { %p2210_p5 = scmp.ne.s32.totalorder %s2576_s2, %s2209_s26  ;;  %p2213_p6 = scmp.lt.u32.totalorder %s2209_s26, %s2576_s2 }
 0x9d8   :  { %p2215_p7 = pnand %p2213_p6, %p2210_p5 }
 0x9da   :  { %2218 = shalt.err (!%p2215_p7)
}
 0x9db   :  { %1767 = dma.vmem_to_hbm [thread:$0]  %s1765_s22, 32, %s2576_s2, [#allocation3]  }
 0x9dc   :  { %2219 = dma.done.wait [#allocation3], 32  }
 0x9dd   :  { %2220 = vsyncadd [#allocation3], 4294967264 }
 0x9de   :  { %1771 = vsyncpa [#allocation3], 1 }

</bundles_post_ra>
